<compile_context>
chip_gen: v7x
topology: tpu7x:2x2x1
jax: 0.10.0
libtpu: 0.0.40
codegen_flags: <defaults>
</compile_context>

<pallas_src>
import numpy as np
import jax
import jax.numpy as jnp
from jax import lax
from jax.experimental import pallas as pl
from jax.experimental.pallas import tpu as pltpu


def _round_up(x, m):
    return ((x + m - 1) // m) * m


def make_fused_kernel(k2, mout):
    def fused_kernel(x_ref, w1_ref, b1_ref, w2_ref, b2_ref, o_ref, mid_ref):
        # ---- stage 1: 1x1 conv as one block-diagonal matmul over the whole
        #      stacked batch (M = Mmid rows).  (+3) is folded into b1 on host;
        #      clamp(0,6) then *1/6.
        mid = jnp.dot(x_ref[...], w1_ref[...], preferred_element_type=jnp.float32)
        mid_ref[...] = jnp.clip(mid + b1_ref[...], 0.0, 6.0) * (1.0 / 6.0)

        # ---- stage 2: 9x9 channels-last conv = 9 banded matmuls, one per
        #      kernel row kh.  The row shift by kh is uniform across the stacked
        #      batch (per-image stride Hpad keeps valid rows from crossing
        #      images), so each dot has the full M = mout rows.  Partial results
        #      are tree-summed to shorten the dependent-add chain.
        parts = [
            jnp.dot(mid_ref[pl.ds(kh, mout), :], w2_ref[kh],
                    preferred_element_type=jnp.float32)
            for kh in range(k2)
        ]
        while len(parts) > 1:
            nxt = [parts[i] + parts[i + 1] for i in range(0, len(parts) - 1, 2)]
            if len(parts) % 2 == 1:
                nxt.append(parts[-1])
            parts = nxt

        # min(min(y,6)/6, 6)/6 == min(y,6) * (1/36)   (inner result <= 1 < 6)
        o_ref[...] = jnp.minimum(parts[0] + b2_ref[...], 6.0) * (1.0 / 36.0)

    return fused_kernel


def build_model(w1, b1, w2_hwio, b2, N, H, W):
    """One-time setup: builds layout-transformed weights (numpy), uploads them
    once, and returns a jitted forward(x) for x of shape (N, 3, H, W)."""
    Cin, Cmid = w1.shape                        # 3, 8
    K2 = w2_hwio.shape[0]                       # 9
    Cout = w2_hwio.shape[3]                     # 8
    Hp, Wp = H + 2, W + 2                       # conv1 padding=1
    Hout, Wout = Hp - K2 + 1, Wp - K2 + 1
    Hpad = _round_up(Hp, 8)                     # sublane-aligned per-image stride
    Cpack = 4                                   # pad channels 3 -> 4
    Lin = _round_up(Wp * Cpack, 128)            # lane-dense input columns
    WC = Wp * Cmid                              # stage-1 output columns
    Ncol = _round_up(Wout * Cout, 128)          # lane-dense output columns
    Mout = N * Hpad                             # stacked stage-2 rows
    Mmid = _round_up(Mout + (K2 - 1), 8)        # stacked stage-1 rows

    # ---------------- host-side weight layout prep (done once) ----------------
    w1_np = np.asarray(w1, np.float32)
    b1_np = np.asarray(b1, np.float32)
    w2_np = np.asarray(w2_hwio, np.float32)
    b2_np = np.asarray(b2, np.float32)

    # stage-1 weight: block-diagonal (Lin, WC); +3 folded into the bias row.
    w1bd = np.zeros((Lin, WC), np.float32)
    for wi in range(Wp):
        w1bd[wi * Cpack:wi * Cpack + Cin, wi * Cmid:(wi + 1) * Cmid] = w1_np
    b1row = np.tile(b1_np + 3.0, Wp).reshape(1, WC)

    # stage-2 weights: K2 banded (WC, Ncol) matrices (output cols zero-padded).
    # wband[kh, wi*Cmid + ci, wo*Cout + co] = w2[kh, wi - wo, ci, co]
    wband = np.zeros((K2, WC, Ncol), np.float32)
    for kh in range(K2):
        for wo in range(Wout):
            for kw in range(K2):
                wi = wo + kw
                wband[kh, wi * Cmid:(wi + 1) * Cmid,
                      wo * Cout:(wo + 1) * Cout] = w2_np[kh, kw]
    b2row = np.zeros((1, Ncol), np.float32)
    b2row[0, :Wout * Cout] = np.tile(b2_np, Wout)

    w1bd_d = jnp.asarray(w1bd)
    b1row_d = jnp.asarray(b1row)
    wband_d = jnp.asarray(wband)
    b2row_d = jnp.asarray(b2row)

    # --------------- single fused, gridless pallas_call -----------------------
    # Everything fits easily in VMEM (< 1 MiB total at these sizes), so the
    # whole problem runs as one kernel invocation with no pipeline overhead.
    call = pl.pallas_call(
        make_fused_kernel(K2, Mout),
        out_shape=jax.ShapeDtypeStruct((Mout, Ncol), jnp.float32),
        scratch_shapes=[pltpu.VMEM((Mmid, WC), jnp.float32)],
    )

    @jax.jit
    def forward(x):
        # NCHW -> spatially padded -> NHWC -> channel/lane/sublane padded ->
        # stacked 2-D (Mmid, Lin) with per-image row stride Hpad.
        x_pad = jnp.pad(x, ((0, 0), (0, 0), (1, 1), (1, 1)))
        x_nhwc = jnp.transpose(x_pad, (0, 2, 3, 1))              # (N,Hp,Wp,Cin)
        x_nhwc = jnp.pad(x_nhwc, ((0, 0), (0, Hpad - Hp),
                                  (0, 0), (0, Cpack - Cin)))
        x2d = x_nhwc.reshape(N, Hpad, Wp * Cpack)
        x2d = jnp.pad(x2d, ((0, 0), (0, 0), (0, Lin - Wp * Cpack)))
        x_all = x2d.reshape(N * Hpad, Lin)
        x_all = jnp.pad(x_all, ((0, Mmid - N * Hpad), (0, 0)))   # (Mmid, Lin)

        out_flat = call(x_all, w1bd_d, b1row_d, wband_d, b2row_d)

        # Strip sublane/lane padding, back to NHWC then NCHW.
        out = out_flat.reshape(N, Hpad, Ncol)[:, :Hout, :Wout * Cout]
        out = out.reshape(N, Hout, Wout, Cout)
        return jnp.transpose(out, (0, 3, 1, 2))

    return forward


def reference(x, w1, b1, w2_hwio, b2):
    """Pure-JAX reference of the (repaired) forward pass."""
    w1_oihw = jnp.transpose(w1, (1, 0))[:, :, None, None]        # (8,3,1,1)
    t1 = lax.conv_general_dilated(
        x, w1_oihw, window_strides=(1, 1), padding=((1, 1), (1, 1)),
        dimension_numbers=("NCHW", "OIHW", "NCHW")) + b1[None, :, None, None]
    t4 = jnp.clip(t1 + 3.0, 0.0, 6.0) / 6.0
    t5 = jnp.transpose(t4, (0, 2, 3, 1))                         # NHWC
    t6 = lax.conv_general_dilated(
        t5, w2_hwio, window_strides=(1, 1), padding="VALID",
        dimension_numbers=("NHWC", "HWIO", "NHWC")) + b2
    t8 = jnp.minimum(t6, 6.0) / 6.0
    t9 = jnp.transpose(t8, (0, 3, 1, 2))                         # NCHW
    return jnp.minimum(t9, 6.0) / 6.0


if __name__ == "__main__":
    key = jax.random.PRNGKey(0)
    k1, k2, k3, k4, k5 = jax.random.split(key, 5)

    N, H, W = 2, 16, 16
    x = jax.random.normal(k1, (N, 3, H, W), jnp.float32)
    # Deterministic synthetic parameters (shapes from the module __init__).
    w1 = 0.30 * jax.random.normal(k2, (3, 8), jnp.float32)        # conv1: (cin, cout)
    b1 = 0.10 * jax.random.normal(k3, (8,), jnp.float32)
    w2 = 0.05 * jax.random.normal(k4, (9, 9, 8, 8), jnp.float32)  # conv2: HWIO
    b2 = 0.10 * jax.random.normal(k5, (8,), jnp.float32)

    forward = build_model(w1, b1, w2, b2, N, H, W)
    out = jax.block_until_ready(forward(x))
    ref = jax.block_until_ready(reference(x, w1, b1, w2, b2))
    assert out.shape == ref.shape == (N, 8, H - 6, W - 6), (out.shape, ref.shape)
    err = float(jnp.max(jnp.abs(out - ref)))
    if not np.isfinite(err) or err > 1e-4:
        raise SystemExit(f"mismatch: max abs err = {err}")
    print("KERNEL_OK")
</pallas_src>

<mosaic_0001>
module attributes {stable_mosaic.version = 11 : i64} {
  func.func @fused_kernel(%arg0: memref<56x128xf32, #tpu.memory_space<vmem>>, %arg1: memref<128x144xf32, #tpu.memory_space<vmem>>, %arg2: memref<1x144xf32, #tpu.memory_space<vmem>>, %arg3: memref<9x144x128xf32, #tpu.memory_space<vmem>>, %arg4: memref<1x128xf32, #tpu.memory_space<vmem>>, %arg5: memref<48x128xf32, #tpu.memory_space<vmem>>, %arg6: memref<56x144xf32, #tpu.memory_space<vmem>>) attributes {dimension_semantics = [], scalar_prefetch = 0 : i64, scratch_operands = 1 : i64, tpu.core_type = #tpu.core_type<tc>} {
    %c0 = arith.constant 0 : index
    %c0_0 = arith.constant 0 : index
    %0 = vector.load %arg0[%c0, %c0_0] : memref<56x128xf32, #tpu.memory_space<vmem>>, vector<56x128xf32>
    %c0_1 = arith.constant 0 : index
    %c0_2 = arith.constant 0 : index
    %1 = vector.load %arg1[%c0_1, %c0_2] : memref<128x144xf32, #tpu.memory_space<vmem>>, vector<128x144xf32>
    %cst = arith.constant dense<0.000000e+00> : vector<56x144xf32>
    %2 = tpu.matmul %0, %1, %cst {dimension_numbers = #tpu.dot_dimension_numbers<[1], [0], [0], [1], [0, 0, 1, 1], [], []>} : vector<56x128xf32>, vector<128x144xf32>, vector<56x144xf32> -> vector<56x144xf32>
    %c0_3 = arith.constant 0 : index
    %c0_4 = arith.constant 0 : index
    %3 = vector.load %arg2[%c0_3, %c0_4] : memref<1x144xf32, #tpu.memory_space<vmem>>, vector<1x144xf32>
    %4 = vector.broadcast %3 : vector<1x144xf32> to vector<56x144xf32>
    %5 = arith.addf %2, %4 : vector<56x144xf32>
    %cst_5 = arith.constant 0.000000e+00 : f32
    %cst_6 = arith.constant 6.000000e+00 : f32
    %6 = vector.broadcast %cst_5 : f32 to vector<56x144xf32>
    %7 = arith.maximumf %6, %5 : vector<56x144xf32>
    %8 = vector.broadcast %cst_6 : f32 to vector<56x144xf32>
    %9 = arith.minimumf %8, %7 : vector<56x144xf32>
    %cst_7 = arith.constant 0.166666672 : f32
    %10 = vector.broadcast %cst_7 : f32 to vector<56x144xf32>
    %11 = arith.mulf %9, %10 : vector<56x144xf32>
    %c0_8 = arith.constant 0 : index
    %c0_9 = arith.constant 0 : index
    %12 = vector.load %arg6[%c0_8, %c0_9] : memref<56x144xf32, #tpu.memory_space<vmem>>, vector<56x144xf32>
    tpu.vector_store %arg6[%c0_8, %c0_9], %11 {strides = array<i32>} : memref<56x144xf32, #tpu.memory_space<vmem>>, vector<56x144xf32>,
    %c0_10 = arith.constant 0 : index
    %c0_11 = arith.constant 0 : index
    %13 = vector.load %arg6[%c0_10, %c0_11] : memref<56x144xf32, #tpu.memory_space<vmem>>, vector<48x144xf32>
    %c0_12 = arith.constant 0 : index
    %c0_13 = arith.constant 0 : index
    %c0_14 = arith.constant 0 : index
    %14 = vector.load %arg3[%c0_12, %c0_13, %c0_14] : memref<9x144x128xf32, #tpu.memory_space<vmem>>, vector<1x144x128xf32>
    %15 = vector.shape_cast %14 : vector<1x144x128xf32> to vector<144x128xf32>
    %cst_15 = arith.constant dense<0.000000e+00> : vector<48x128xf32>
    %16 = tpu.matmul %13, %15, %cst_15 {dimension_numbers = #tpu.dot_dimension_numbers<[1], [0], [0], [1], [0, 0, 1, 1], [], []>} : vector<48x144xf32>, vector<144x128xf32>, vector<48x128xf32> -> vector<48x128xf32>
    %c1 = arith.constant 1 : index
    %c0_16 = arith.constant 0 : index
    %17 = vector.load %arg6[%c1, %c0_16] : memref<56x144xf32, #tpu.memory_space<vmem>>, vector<48x144xf32>
    %c1_17 = arith.constant 1 : index
    %c0_18 = arith.constant 0 : index
    %c0_19 = arith.constant 0 : index
    %18 = vector.load %arg3[%c1_17, %c0_18, %c0_19] : memref<9x144x128xf32, #tpu.memory_space<vmem>>, vector<1x144x128xf32>
    %19 = vector.shape_cast %18 : vector<1x144x128xf32> to vector<144x128xf32>
    %cst_20 = arith.constant dense<0.000000e+00> : vector<48x128xf32>
    %20 = tpu.matmul %17, %19, %cst_20 {dimension_numbers = #tpu.dot_dimension_numbers<[1], [0], [0], [1], [0, 0, 1, 1], [], []>} : vector<48x144xf32>, vector<144x128xf32>, vector<48x128xf32> -> vector<48x128xf32>
    %c2 = arith.constant 2 : index
    %c0_21 = arith.constant 0 : index
    %21 = vector.load %arg6[%c2, %c0_21] : memref<56x144xf32, #tpu.memory_space<vmem>>, vector<48x144xf32>
    %c2_22 = arith.constant 2 : index
    %c0_23 = arith.constant 0 : index
    %c0_24 = arith.constant 0 : index
    %22 = vector.load %arg3[%c2_22, %c0_23, %c0_24] : memref<9x144x128xf32, #tpu.memory_space<vmem>>, vector<1x144x128xf32>
    %23 = vector.shape_cast %22 : vector<1x144x128xf32> to vector<144x128xf32>
    %cst_25 = arith.constant dense<0.000000e+00> : vector<48x128xf32>
    %24 = tpu.matmul %21, %23, %cst_25 {dimension_numbers = #tpu.dot_dimension_numbers<[1], [0], [0], [1], [0, 0, 1, 1], [], []>} : vector<48x144xf32>, vector<144x128xf32>, vector<48x128xf32> -> vector<48x128xf32>
    %c3 = arith.constant 3 : index
    %c0_26 = arith.constant 0 : index
    %25 = vector.load %arg6[%c3, %c0_26] : memref<56x144xf32, #tpu.memory_space<vmem>>, vector<48x144xf32>
    %c3_27 = arith.constant 3 : index
    %c0_28 = arith.constant 0 : index
    %c0_29 = arith.constant 0 : index
    %26 = vector.load %arg3[%c3_27, %c0_28, %c0_29] : memref<9x144x128xf32, #tpu.memory_space<vmem>>, vector<1x144x128xf32>
    %27 = vector.shape_cast %26 : vector<1x144x128xf32> to vector<144x128xf32>
    %cst_30 = arith.constant dense<0.000000e+00> : vector<48x128xf32>
    %28 = tpu.matmul %25, %27, %cst_30 {dimension_numbers = #tpu.dot_dimension_numbers<[1], [0], [0], [1], [0, 0, 1, 1], [], []>} : vector<48x144xf32>, vector<144x128xf32>, vector<48x128xf32> -> vector<48x128xf32>
    %c4 = arith.constant 4 : index
    %c0_31 = arith.constant 0 : index
    %29 = vector.load %arg6[%c4, %c0_31] : memref<56x144xf32, #tpu.memory_space<vmem>>, vector<48x144xf32>
    %c4_32 = arith.constant 4 : index
    %c0_33 = arith.constant 0 : index
    %c0_34 = arith.constant 0 : index
    %30 = vector.load %arg3[%c4_32, %c0_33, %c0_34] : memref<9x144x128xf32, #tpu.memory_space<vmem>>, vector<1x144x128xf32>
    %31 = vector.shape_cast %30 : vector<1x144x128xf32> to vector<144x128xf32>
    %cst_35 = arith.constant dense<0.000000e+00> : vector<48x128xf32>
    %32 = tpu.matmul %29, %31, %cst_35 {dimension_numbers = #tpu.dot_dimension_numbers<[1], [0], [0], [1], [0, 0, 1, 1], [], []>} : vector<48x144xf32>, vector<144x128xf32>, vector<48x128xf32> -> vector<48x128xf32>
    %c5 = arith.constant 5 : index
    %c0_36 = arith.constant 0 : index
    %33 = vector.load %arg6[%c5, %c0_36] : memref<56x144xf32, #tpu.memory_space<vmem>>, vector<48x144xf32>
    %c5_37 = arith.constant 5 : index
    %c0_38 = arith.constant 0 : index
    %c0_39 = arith.constant 0 : index
    %34 = vector.load %arg3[%c5_37, %c0_38, %c0_39] : memref<9x144x128xf32, #tpu.memory_space<vmem>>, vector<1x144x128xf32>
    %35 = vector.shape_cast %34 : vector<1x144x128xf32> to vector<144x128xf32>
    %cst_40 = arith.constant dense<0.000000e+00> : vector<48x128xf32>
    %36 = tpu.matmul %33, %35, %cst_40 {dimension_numbers = #tpu.dot_dimension_numbers<[1], [0], [0], [1], [0, 0, 1, 1], [], []>} : vector<48x144xf32>, vector<144x128xf32>, vector<48x128xf32> -> vector<48x128xf32>
    %c6 = arith.constant 6 : index
    %c0_41 = arith.constant 0 : index
    %37 = vector.load %arg6[%c6, %c0_41] : memref<56x144xf32, #tpu.memory_space<vmem>>, vector<48x144xf32>
    %c6_42 = arith.constant 6 : index
    %c0_43 = arith.constant 0 : index
    %c0_44 = arith.constant 0 : index
    %38 = vector.load %arg3[%c6_42, %c0_43, %c0_44] : memref<9x144x128xf32, #tpu.memory_space<vmem>>, vector<1x144x128xf32>
    %39 = vector.shape_cast %38 : vector<1x144x128xf32> to vector<144x128xf32>
    %cst_45 = arith.constant dense<0.000000e+00> : vector<48x128xf32>
    %40 = tpu.matmul %37, %39, %cst_45 {dimension_numbers = #tpu.dot_dimension_numbers<[1], [0], [0], [1], [0, 0, 1, 1], [], []>} : vector<48x144xf32>, vector<144x128xf32>, vector<48x128xf32> -> vector<48x128xf32>
    %c7 = arith.constant 7 : index
    %c0_46 = arith.constant 0 : index
    %41 = vector.load %arg6[%c7, %c0_46] : memref<56x144xf32, #tpu.memory_space<vmem>>, vector<48x144xf32>
    %c7_47 = arith.constant 7 : index
    %c0_48 = arith.constant 0 : index
    %c0_49 = arith.constant 0 : index
    %42 = vector.load %arg3[%c7_47, %c0_48, %c0_49] : memref<9x144x128xf32, #tpu.memory_space<vmem>>, vector<1x144x128xf32>
    %43 = vector.shape_cast %42 : vector<1x144x128xf32> to vector<144x128xf32>
    %cst_50 = arith.constant dense<0.000000e+00> : vector<48x128xf32>
    %44 = tpu.matmul %41, %43, %cst_50 {dimension_numbers = #tpu.dot_dimension_numbers<[1], [0], [0], [1], [0, 0, 1, 1], [], []>} : vector<48x144xf32>, vector<144x128xf32>, vector<48x128xf32> -> vector<48x128xf32>
    %c8 = arith.constant 8 : index
    %c0_51 = arith.constant 0 : index
    %45 = vector.load %arg6[%c8, %c0_51] : memref<56x144xf32, #tpu.memory_space<vmem>>, vector<48x144xf32>
    %c8_52 = arith.constant 8 : index
    %c0_53 = arith.constant 0 : index
    %c0_54 = arith.constant 0 : index
    %46 = vector.load %arg3[%c8_52, %c0_53, %c0_54] : memref<9x144x128xf32, #tpu.memory_space<vmem>>, vector<1x144x128xf32>
    %47 = vector.shape_cast %46 : vector<1x144x128xf32> to vector<144x128xf32>
    %cst_55 = arith.constant dense<0.000000e+00> : vector<48x128xf32>
    %48 = tpu.matmul %45, %47, %cst_55 {dimension_numbers = #tpu.dot_dimension_numbers<[1], [0], [0], [1], [0, 0, 1, 1], [], []>} : vector<48x144xf32>, vector<144x128xf32>, vector<48x128xf32> -> vector<48x128xf32>
    %49 = arith.addf %16, %20 : vector<48x128xf32>
    %50 = arith.addf %24, %28 : vector<48x128xf32>
    %51 = arith.addf %32, %36 : vector<48x128xf32>
    %52 = arith.addf %40, %44 : vector<48x128xf32>
    %53 = arith.addf %49, %50 : vector<48x128xf32>
    %54 = arith.addf %51, %52 : vector<48x128xf32>
    %55 = arith.addf %53, %54 : vector<48x128xf32>
    %56 = arith.addf %55, %48 : vector<48x128xf32>
    %c0_56 = arith.constant 0 : index
    %c0_57 = arith.constant 0 : index
    %57 = vector.load %arg4[%c0_56, %c0_57] : memref<1x128xf32, #tpu.memory_space<vmem>>, vector<1x128xf32>
    %58 = vector.broadcast %57 : vector<1x128xf32> to vector<48x128xf32>
    %59 = arith.addf %56, %58 : vector<48x128xf32>
    %cst_58 = arith.constant 6.000000e+00 : f32
    %60 = vector.broadcast %cst_58 : f32 to vector<48x128xf32>
    %61 = arith.minimumf %59, %60 : vector<48x128xf32>
    %cst_59 = arith.constant 0.027777778 : f32
    %62 = vector.broadcast %cst_59 : f32 to vector<48x128xf32>
    %63 = arith.mulf %61, %62 : vector<48x128xf32>
    %c0_60 = arith.constant 0 : index
    %c0_61 = arith.constant 0 : index
    %64 = vector.load %arg5[%c0_60, %c0_61] : memref<48x128xf32, #tpu.memory_space<vmem>>, vector<48x128xf32>
    tpu.vector_store %arg5[%c0_60, %c0_61], %63 {strides = array<i32>} : memref<48x128xf32, #tpu.memory_space<vmem>>, vector<48x128xf32>,
    return
  }
}

</mosaic_0001>

<bundles_post_ra>
// kernel: forward.1
= control target key start
LH: loop header
LB: loop body
LE: loop exit
PB: predicated region body
PF: predicated region fallthrough
CT: control target
= control target key end

     0   :  { %10 = vsyncpa [#allocation4], 0  ;;  %s2114_s18 = smov [#allocation3]   ;;  %s2793_s0 = inlined_call_operand.vmem [shape: f32[56,128], index: 0, kind: input, shape index: {}]   ;;  %s2794_s1 = inlined_call_operand.vmem [shape: f32[128,144], index: 1, kind: input, shape index: {}]   ;;  %s2795_s2 = inlined_call_operand.vmem [shape: f32[1,144], index: 2, kind: input, shape index: {}]   ;;  %s2796_s3 = inlined_call_operand.hbm [shape: f32[9,144,128], index: 3, kind: input, shape index: {}]   ;;  %s2797_s4 = inlined_call_operand.vmem [shape: f32[1,128], index: 4, kind: input, shape index: {}]   ;;  %s2798_s5 = inlined_call_operand.vmem [shape: f32[48,128], index: 5, kind: output, shape index: {}]  }
   0x1   :  { %s22_s19 = sshll.u32 %s2114_s18, 4  ;;  %s2090_s22 = scalar_lea.hbm %s2796_s3, 20736  ;;  %s23_s19 = int_to_ptr.vmem [resolvable:$true] %s22_s19 }
   0x2   :  { %p2091_p0 = scmp.ne.s32.totalorder %s2796_s3, %s2090_s22  ;;  %p2094_p1 = scmp.lt.u32.totalorder %s2090_s22, %s2796_s3 }
   0x4   :  { %p2096_p2 = pnand %p2094_p1, %p2091_p0 }
   0x6   :  { %2099 = shalt.err (!%p2096_p2)
}
   0x7   :  { %s2100_s27 = scalar_lea.vmem %s23_s19, 20736  ;;  %p2105_p4 = scmp.lt.s32.totalorder %s23_s19, %s23_s19 }
   0x8   :  { %p2101_p3 = scmp.ne.s32.totalorder %s23_s19, %s2100_s27  ;;  %p2106_p5 = scmp.lt.s32.totalorder %s2100_s27, %s2100_s27 }
   0xa   :  { %p2107_p6 = por %p2106_p5, %p2105_p4 }
   0xc   :  { %p2108_p7 = pnand %p2107_p6, %p2101_p3 }
   0xe   :  { %2111 = shalt.err (!%p2108_p7)
}
   0xf   :  { %s2115_s28 = smov 128   ;;  %s2116_s29 = smov 8  }
  0x10   :  { %28 = dma.hbm_to_vmem [thread:$0]  %s2796_s3, 20736, %s23_s19, [#allocation4], %s2115_s28, %s2115_s28, %s2116_s29  }
  0x11   :  { %2112 = dma.done.wait [#allocation4], 20736  }
  0x12   :  { %2113 = vsyncadd [#allocation4], 4294946560  ;;  %v2117_v0 = vmov 0.0   ;;  %v2118_v1 = vmov 0.0|0.0   ;;  %v42_v2 = vld [vmem:[%s2794_s1 + $0x8] sm:$0xff]  ;;  %v44_v3 = vld [vmem:[%s2794_s1 + $0x18] sm:$0xff] }
  0x13   :  { %149 = vmatprep.mubr.f32.mxu0 %v2117_v0  ;;  %1832 = vmatprep.subr.bf16.mxu1 %v2118_v1  ;;  %v41_v4 = vld [vmem:[%s2794_s1] sm:$0xff]  ;;  %v1800_v5 = vpack.c.bf16 %v44_v3, %v42_v2  ;;  %v43_v6 = vld [vmem:[%s2794_s1 + $0x10] sm:$0xff]  ;;  %v46_v7 = vld [vmem:[%s2794_s1 + $0x28] sm:$0xff]  ;;  %vm235_vm0 = vcmask 130048   ;;  %vm316_vm1 = vcmask 1046528   ;;  %vm506_vm2 = vcmask 1044480  }
  0x14   :  { %v48_v8 = vld [vmem:[%s2794_s1 + $0x38] sm:$0xff]  ;;  %v1802_v9 = vpack.c.bf16 %v43_v6, %v41_v4  ;;  %v45_v11 = vld [vmem:[%s2794_s1 + $0x20] sm:$0xff]  ;;  %v47_v12 = vld [vmem:[%s2794_s1 + $0x30] sm:$0xff]  ;;  %vm696_vm3 = vcmask 1042432   ;;  %vm886_vm4 = vcmask 1040384   ;;  %vm1257_vm5 = vcmask 1045504  }
  0x15   :  { %v1804_v10 = vpack.c.bf16 %v48_v8, %v46_v7  ;;  %v50_v13 = vld [vmem:[%s2794_s1 + $0x48] sm:$0xff]  ;;  %1801 = vmatprep.subr.bf16.mxu0 %v1800_v5  ;;  %v52_v14 = vld [vmem:[%s2794_s1 + $0x58] sm:$0xff]  ;;  %v1806_v15 = vpack.c.bf16 %v47_v12, %v45_v11  ;;  %v49_v17 = vld [vmem:[%s2794_s1 + $0x40] sm:$0xff]  ;;  %vm1401_vm6 = vcmask 1043456   ;;  %vm1545_vm7 = vcmask 1041408  }
  0x16   :  { %1803 = vmatpush1.bf16.msra.mxu0 %v1802_v9  ;;  %v1808_v16 = vpack.c.bf16 %v52_v14, %v50_v13  ;;  %v51_v18 = vld [vmem:[%s2794_s1 + $0x50] sm:$0xff]  ;;  %v54_v19 = vld [vmem:[%s2794_s1 + $0x68] sm:$0xff]  ;;  %v56_v20 = vld [vmem:[%s2794_s1 + $0x78] sm:$0xff] }
  0x17   :  { %1805 = vmatprep.subr.bf16.mxu0 %v1804_v10  ;;  %v1810_v21 = vpack.c.bf16 %v51_v18, %v49_v17  ;;  %v1812_v22 = vpack.c.bf16 %v56_v20, %v54_v19  ;;  %v53_v23 = vld [vmem:[%s2794_s1 + $0x60] sm:$0xff]  ;;  %v55_v24 = vld [vmem:[%s2794_s1 + $0x70] sm:$0xff]  ;;  %v58_v25 = vld [vmem:[%s2794_s1 + $0x88] sm:$0xff] }
  0x18   :  { %v60_v26 = vld [vmem:[%s2794_s1 + $0x98] sm:$0xff]  ;;  %v1814_v27 = vpack.c.bf16 %v55_v24, %v53_v23  ;;  %v57_v28 = vld [vmem:[%s2794_s1 + $0x80] sm:$0xff]  ;;  %v59_v29 = vld [vmem:[%s2794_s1 + $0x90] sm:$0xff] }
  0x19   :  { %v1816_v30 = vpack.c.bf16 %v60_v26, %v58_v25  ;;  %v62_v31 = vld [vmem:[%s2794_s1 + $0xa8] sm:$0xff]  ;;  %v284_v32 = vld [vmem:[#allocation3 + $0x90] sm:$0xff]  ;;  %v64_v34 = vld [vmem:[%s2794_s1 + $0xb8] sm:$0xff]  ;;  %v1818_v38 = vpack.c.bf16 %v59_v29, %v57_v28 }
  0x1a   :  { %1807 = vmatpush1.bf16.msra.mxu0 %v1806_v15  ;;  %v285_v33 = vld [vmem:[#allocation3 + $0x98] sm:$0xff]  ;;  %v286_v36 = vld [vmem:[#allocation3 + $0xa0] sm:$0xff]  ;;  %v287_v37 = vld [vmem:[#allocation3 + $0xa8] sm:$0xff]  ;;  %v1820_v41 = vpack.c.bf16 %v64_v34, %v62_v31 }
  0x1b   :  { %1809 = vmatprep.subr.bf16.mxu0 %v1808_v16  ;;  %v1833_v35 = vpack.c.bf16 %v285_v33, %v284_v32  ;;  %v61_v39 = vld [vmem:[%s2794_s1 + $0xa0] sm:$0xff]  ;;  %v1836_v40 = vpack.c.bf16 %v287_v37, %v286_v36  ;;  %v63_v42 = vld [vmem:[%s2794_s1 + $0xb0] sm:$0xff]  ;;  %v289_v44 = vld [vmem:[#allocation3 + $0xb8] sm:$0xff] }
  0x1c   :  { %v288_v43 = vld [vmem:[#allocation3 + $0xb0] sm:$0xff]  ;;  %v66_v45 = vld [vmem:[%s2794_s1 + $0xc8] sm:$0xff]  ;;  %v68_v46 = vld [vmem:[%s2794_s1 + $0xd8] sm:$0xff]  ;;  %v1822_v47 = vpack.c.bf16 %v63_v42, %v61_v39 }
  0x1d   :  { %1834 = vmatpush1.bf16.msra.mxu1 %v1833_v35  ;;  %v1839_v48 = vpack.c.bf16 %v289_v44, %v288_v43  ;;  %v1824_v49 = vpack.c.bf16 %v68_v46, %v66_v45  ;;  %v65_v50 = vld [vmem:[%s2794_s1 + $0xc0] sm:$0xff]  ;;  %v67_v51 = vld [vmem:[%s2794_s1 + $0xd0] sm:$0xff]  ;;  %v70_v52 = vld [vmem:[%s2794_s1 + $0xe8] sm:$0xff] }
  0x1e   :  { %1811 = vmatpush1.bf16.msra.mxu0 %v1810_v21  ;;  %1835 = vmatprep.subr.bf16.mxu1 %v2118_v1  ;;  %v72_v53 = vld [vmem:[%s2794_s1 + $0xf8] sm:$0xff]  ;;  %v1826_v54 = vpack.c.bf16 %v67_v51, %v65_v50  ;;  %v69_v56 = vld [vmem:[%s2794_s1 + $0xe0] sm:$0xff]  ;;  %v71_v57 = vld [vmem:[%s2794_s1 + $0xf0] sm:$0xff] }
  0x1f   :  { %1813 = vmatprep.subr.bf16.mxu0 %v1812_v22  ;;  %v1828_v55 = vpack.c.bf16 %v72_v53, %v70_v52  ;;  %v1830_v58 = vpack.c.bf16 %v71_v57, %v69_v56  ;;  %v484_v59 = vld [vmem:[#allocation3 + $0x1b0] sm:$0xff]  ;;  %v485_v60 = vld [vmem:[#allocation3 + $0x1b8] sm:$0xff]  ;;  %v486_v63 = vld [vmem:[#allocation3 + $0x1c0] sm:$0xff] }
  0x20   :  { %v34_v61 = vld [vmem:[%s2793_s0] sm:$0xff]  ;;  %v1860_v62 = vpack.c.bf16 %v485_v60, %v484_v59  ;;  %v487_v2 = vld [vmem:[#allocation3 + $0x1c8] sm:$0xff]  ;;  %v35_v3 = vld [vmem:[%s2793_s0 + $0x8] sm:$0xff] }
  0x21   :  { %1837 = vmatpush1.bf16.msra.mxu1 %v1836_v40  ;;  %v1863_v4 = vpack.c.bf16 %v487_v2, %v486_v63  ;;  %v488_v5 = vld [vmem:[#allocation3 + $0x1d0] sm:$0xff]  ;;  %v489_v6 = vld [vmem:[#allocation3 + $0x1d8] sm:$0xff]  ;;  %v36_v7 = vld [vmem:[%s2793_s0 + $0x10] sm:$0xff] }
  0x22   :  { %1815 = vmatpush1.bf16.msra.mxu0 %v1814_v27  ;;  %1838 = vmatprep.subr.bf16.mxu1 %v2118_v1  ;;  %v1866_v8 = vpack.c.bf16 %v489_v6, %v488_v5  ;;  %v37_v9 = vld [vmem:[%s2793_s0 + $0x18] sm:$0xff]  ;;  %v38_v10 = vld [vmem:[%s2793_s0 + $0x20] sm:$0xff]  ;;  %v39_v11 = vld [vmem:[%s2793_s0 + $0x28] sm:$0xff] }
  0x23   :  { %1817 = vmatprep.subr.bf16.mxu0 %v1816_v30  ;;  %v40_v12 = vld [vmem:[%s2793_s0 + $0x30] sm:$0xff]  ;;  %v291_v14 = vld [vmem:[#allocation3 + $0xc8] sm:$0xff]  ;;  %v292_v19 = vld [vmem:[#allocation3 + $0xd0] sm:$0xff] }
  0x24   :  { %v290_v13 = vld [vmem:[#allocation3 + $0xc0] sm:$0xff]  ;;  %v491_v17 = vld [vmem:[#allocation3 + $0x1e8] sm:$0xff]  ;;  %v293_v20 = vld [vmem:[#allocation3 + $0xd8] sm:$0xff] }
  0x25   :  { %1840 = vmatpush1.bf16.msra.mxu1 %v1839_v48  ;;  %v490_v15 = vld [vmem:[#allocation3 + $0x1e0] sm:$0xff]  ;;  %v1842_v16 = vpack.c.bf16 %v291_v14, %v290_v13  ;;  %v492_v21 = vld [vmem:[#allocation3 + $0x1f0] sm:$0xff]  ;;  %v493_v22 = vld [vmem:[#allocation3 + $0x1f8] sm:$0xff]  ;;  %v75_v48 = vlaneseq }
  0x26   :  { %1819 = vmatpush1.bf16.msra.mxu0 %v1818_v38  ;;  %1841 = vmatprep.subr.bf16.mxu1 %v2118_v1  ;;  %v1869_v18 = vpack.c.bf16 %v491_v17, %v490_v15  ;;  %v1872_v23 = vpack.c.bf16 %v493_v22, %v492_v21  ;;  %v294_v24 = vld [vmem:[#allocation3 + $0xe0] sm:$0xff]  ;;  %v295_v25 = vld [vmem:[#allocation3 + $0xe8] sm:$0xff]  ;;  %v296_v30 = vld [vmem:[#allocation3 + $0xf0] sm:$0xff] }
  0x27   :  { %1821 = vmatprep.subr.bf16.mxu0 %v1820_v41  ;;  %v494_v26 = vld [vmem:[#allocation3 + $0x200] sm:$0xff]  ;;  %v1848_v27 = vpack.c.bf16 %v295_v25, %v294_v24  ;;  %v495_v28 = vld [vmem:[#allocation3 + $0x208] sm:$0xff]  ;;  %v297_v31 = vld [vmem:[#allocation3 + $0xf8] sm:$0xff] }
  0x28   :  { %v1875_v29 = vpack.c.bf16 %v495_v28, %v494_v26  ;;  %v496_v32 = vld [vmem:[#allocation3 + $0x210] sm:$0xff]  ;;  %v1851_v33 = vpack.c.bf16 %v297_v31, %v296_v30  ;;  %v497_v34 = vld [vmem:[#allocation3 + $0x218] sm:$0xff]  ;;  %v298_v36 = vld [vmem:[#allocation3 + $0x100] sm:$0xff] }
  0x29   :  { %1843 = vmatpush1.bf16.msra.mxu1 %v1842_v16  ;;  %v1878_v35 = vpack.c.bf16 %v497_v34, %v496_v32  ;;  %v299_v37 = vld [vmem:[#allocation3 + $0x108] sm:$0xff]  ;;  %v498_v38 = vld [vmem:[#allocation3 + $0x220] sm:$0xff]  ;;  %v300_v42 = vld [vmem:[#allocation3 + $0x110] sm:$0xff] }
  0x2a   :  { %1823 = vmatpush1.bf16.msra.mxu0 %v1822_v47  ;;  %1844 = vmatprep.subr.bf16.mxu1 %v2118_v1  ;;  %v1854_v39 = vpack.c.bf16 %v299_v37, %v298_v36  ;;  %v499_v40 = vld [vmem:[#allocation3 + $0x228] sm:$0xff]  ;;  %v301_v43 = vld [vmem:[#allocation3 + $0x118] sm:$0xff]  ;;  %v500_v44 = vld [vmem:[#allocation3 + $0x230] sm:$0xff] }
  0x2b   :  { %1825 = vmatprep.subr.bf16.mxu0 %v1824_v49  ;;  %v1881_v41 = vpack.c.bf16 %v499_v40, %v498_v38  ;;  %v1857_v45 = vpack.c.bf16 %v301_v43, %v300_v42  ;;  %v501_v46 = vld [vmem:[#allocation3 + $0x238] sm:$0xff]  ;;  %v76_v49 = vshrl.u32 %v75_v48, 7  ;;  %v73_v51 = vld [vmem:[%s2795_s2] sm:$0x3]  ;;  %v2338_v30 = vld [vmem:[#allocation3 + $0x2e0] sm:$0xff] }
  0x2c   :  { %v1884_v47 = vpack.c.bf16 %v501_v46, %v500_v44  ;;  %v2328_v24 = vld [vmem:[#allocation3 + $0x2d0] sm:$0xff]  ;;  %v2330_v25 = vld [vmem:[#allocation3 + $0x2d8] sm:$0xff]  ;;  %v2340_v31 = vld [vmem:[#allocation3 + $0x2e8] sm:$0xff] }
  0x2d   :  { %v77_v50 = vsub.s32 0, %v76_v49  ;;  %v81_v52 = vsub.s32 1, %v76_v49  ;;  %v2332_v26 = vld [vmem:[#allocation3 + $0x3f0] sm:$0xff]  ;;  %v1887_v40 = vpack.c.bf16 %v2330_v25, %v2328_v24  ;;  %v1890_v46 = vpack.c.bf16 %v2340_v31, %v2338_v30 }
  0x2e   :  { %1827 = vmatpush1.bf16.msra.mxu0 %v1826_v54 }
  0x2f   :  { %1829 = vmatprep.subr.bf16.mxu0 %v1828_v55  ;;  %v2308_v53 = vrot.slane %v73_v51, %v77_v50  ;;  %v2310_v54 = vrot.slane %v73_v51, %v81_v52 }
  0x32   :  { %1831 = vmatpush1.bf16.msra.mxu0 %v1830_v58 }
  0x33   :  { %1859 = vmatprep.subr.bf16.mxu0 %v2118_v1 }
  0x35   :  { %150 = vmatmul.mubr.f32.vlgmr.msra.gmra.mrb[0].mxu0 %v34_v61 }
  0x36   :  { %155 = vmatprep.mubr.f32.mxu0 %v2117_v0  ;;  %1861 = vmatpush1.bf16.msra.mxu0 %v1860_v62 }
  0x37   :  { %1862 = vmatprep.subr.bf16.mxu0 %v2118_v1 }
  0x39   :  { %156 = vmatmul.mubr.f32.gmra.mrb[2].mxu0 %v35_v3 }
  0x3a   :  { %161 = vmatprep.mubr.f32.mxu0 %v2117_v0  ;;  %1864 = vmatpush1.bf16.msra.mxu0 %v1863_v4 }
  0x3b   :  { %1865 = vmatprep.subr.bf16.mxu0 %v2118_v1 }
  0x3d   :  { %162 = vmatmul.mubr.f32.gmra.mrb[4].mxu0 %v36_v7 }
  0x3e   :  { %167 = vmatprep.mubr.f32.mxu0 %v2117_v0  ;;  %1867 = vmatpush1.bf16.msra.mxu0 %v1866_v8 }
  0x3f   :  { %1868 = vmatprep.subr.bf16.mxu0 %v2118_v1 }
  0x41   :  { %168 = vmatmul.mubr.f32.gmra.mrb[6].mxu0 %v37_v9 }
  0x42   :  { %173 = vmatprep.mubr.f32.mxu0 %v2117_v0  ;;  %1870 = vmatpush1.bf16.msra.mxu0 %v1869_v18 }
  0x43   :  { %1871 = vmatprep.subr.bf16.mxu0 %v2118_v1 }
  0x45   :  { %174 = vmatmul.mubr.f32.gmra.mrb[8].mxu0 %v38_v10 }
  0x46   :  { %179 = vmatprep.mubr.f32.mxu0 %v2117_v0  ;;  %1873 = vmatpush1.bf16.msra.mxu0 %v1872_v23 }
  0x47   :  { %1874 = vmatprep.subr.bf16.mxu0 %v2118_v1 }
  0x49   :  { %180 = vmatmul.mubr.f32.gmra.mrb[10].mxu0 %v39_v11 }
  0x4a   :  { %185 = vmatprep.mubr.f32.mxu0 %v2117_v0  ;;  %v1845_v0 = vpack.c.bf16 %v293_v20, %v292_v19  ;;  %1876 = vmatpush1.bf16.msra.mxu0 %v1875_v29  ;;  %v2336_v29 = vld [vmem:[#allocation3 + $0x3f8] sm:$0xff] }
  0x4b   :  { %1877 = vmatprep.subr.bf16.mxu0 %v2118_v1 }
  0x4c   :  { %1846 = vmatpush1.bf16.msra.mxu1 %v1845_v0 }
  0x4d   :  { %186 = vmatmul.mubr.f32.gmra.mrb[12].mxu0 %v40_v12  ;;  %1847 = vmatprep.subr.bf16.mxu1 %v2118_v1 }
  0x4e   :  { %1879 = vmatpush1.bf16.msra.mxu0 %v1878_v35 }
  0x4f   :  { %1880 = vmatprep.subr.bf16.mxu0 %v2118_v1 }
  0x50   :  { %1849 = vmatpush1.bf16.msra.mxu1 %v1848_v27 }
  0x51   :  { %1850 = vmatprep.subr.bf16.mxu1 %v2118_v1 }
  0x52   :  { %1882 = vmatpush1.bf16.msra.mxu0 %v1881_v41 }
  0x53   :  { %1883 = vmatprep.subr.bf16.mxu0 %v2118_v1 }
  0x54   :  { %1852 = vmatpush1.bf16.msra.mxu1 %v1851_v33 }
  0x55   :  { %1853 = vmatprep.subr.bf16.mxu1 %v2118_v1 }
  0x56   :  { %1885 = vmatpush1.bf16.msra.mxu0 %v1884_v47 }
  0x57   :  { %1913 = vmatprep.subr.bf16.mxu0 %v2118_v1 }
  0x58   :  { %1855 = vmatpush1.bf16.msra.mxu1 %v1854_v39 }
  0x59   :  { %1856 = vmatprep.subr.bf16.mxu1 %v2118_v1 }
  0x5c   :  { %1858 = vmatpush1.bf16.msra.mxu1 %v1857_v45  ;;  %v1914_v45 = vpack.c.bf16 %v2336_v29, %v2332_v26 }
  0x5d   :  { %1886 = vmatprep.subr.bf16.mxu1 %v2118_v1 }
 0x108   :  { %v151_v55 = vpop.f32.mrb[0].mxu0 }
 0x109   :  { %v152_v56 = vadd.f32 %v151_v55, %v2308_v53  ;;  %v153_v57 = vpop.f32.mrb[1].mxu0 }
 0x10a   :  { %v154_v58 = vadd.f32 %v153_v57, %v2310_v54 }
 0x10b   :  { %v192_v59 = vmax.f32 %v152_v56, 0.0 }
 0x10c   :  { %v193_v60 = vmax.f32 %v154_v58, 0.0  ;;  %v157_v61 = vpop.f32.mrb[2].mxu0 }
 0x10d   :  { %v206_v62 = vmin.f32 %v192_v59, 6.0  ;;  %v158_v63 = vadd.f32 %v157_v61, %v2308_v53  ;;  %v159_v2 = vpop.f32.mrb[3].mxu0 }
 0x10e   :  { %v207_v3 = vmin.f32 %v193_v60, 6.0  ;;  %v160_v4 = vadd.f32 %v159_v2, %v2310_v54 }
 0x10f   :  { %v2316_v5 = vmul.f32 0.16666667, %v206_v62  ;;  %v194_v6 = vmax.f32 %v158_v63, 0.0 }
 0x110   :  { %v221_v7 = vmul.f32 0.16666667, %v207_v3  ;;  %v195_v8 = vmax.f32 %v160_v4, 0.0  ;;  %v163_v9 = vpop.f32.mrb[4].mxu0 }
 0x111   :  { %234 = vst [vmem:[#allocation2] sm:$0xff] %v2316_v5  ;;  %v208_v10 = vmin.f32 %v194_v6, 6.0  ;;  %v164_v11 = vadd.f32 %v163_v9, %v2308_v53  ;;  %v165_v12 = vpop.f32.mrb[5].mxu0 }
 0x112   :  { %236 = vst.msk [vmem:[#allocation2 + $0x8] sm:$0xff] %vm235_vm0, %v221_v7  ;;  %v209_v13 = vmin.f32 %v195_v8, 6.0  ;;  %v166_v14 = vadd.f32 %v165_v12, %v2310_v54 }
 0x113   :  { %v2322_v15 = vmul.f32 0.16666667, %v208_v10  ;;  %v196_v16 = vmax.f32 %v164_v11, 0.0 }
 0x114   :  { %v223_v17 = vmul.f32 0.16666667, %v209_v13  ;;  %v197_v18 = vmax.f32 %v166_v14, 0.0  ;;  %v169_v19 = vpop.f32.mrb[6].mxu0 }
 0x115   :  { %237 = vst [vmem:[#allocation2 + $0x10] sm:$0xff] %v2322_v15  ;;  %v210_v20 = vmin.f32 %v196_v16, 6.0  ;;  %v170_v21 = vadd.f32 %v169_v19, %v2308_v53  ;;  %v171_v0 = vpop.f32.mrb[7].mxu0  ;;  %v318_v49 = vrot.slane %v2322_v15, 1  ;;  %v508_v50 = vrot.slane %v2322_v15, 3 }
 0x116   :  { %238 = vst.msk [vmem:[#allocation2 + $0x18] sm:$0xff] %vm235_vm0, %v223_v17  ;;  %v211_v22 = vmin.f32 %v197_v18, 6.0  ;;  %v172_v23 = vadd.f32 %v171_v0, %v2310_v54  ;;  %v866_v17 = vld [vmem:[#allocation3 + $0x400] sm:$0xff]  ;;  %v867_v18 = vld [vmem:[#allocation3 + $0x408] sm:$0xff] }
 0x117   :  { %v2334_v27 = vmul.f32 0.16666667, %v210_v20  ;;  %v198_v28 = vmax.f32 %v170_v21, 0.0 }
 0x118   :  { %v225_v32 = vmul.f32 0.16666667, %v211_v22  ;;  %v199_v33 = vmax.f32 %v172_v23, 0.0  ;;  %v175_v34 = vpop.f32.mrb[8].mxu0  ;;  %v279_v43 = vld [vmem:[#allocation2] sm:$0xfe] }
 0x119   :  { %239 = vst [vmem:[#allocation2 + $0x20] sm:$0xff] %v2334_v27  ;;  %v212_v35 = vmin.f32 %v198_v28, 6.0  ;;  %v176_v36 = vadd.f32 %v175_v34, %v2308_v53  ;;  %v177_v37 = vpop.f32.mrb[9].mxu0  ;;  %v280_v38 = vld [vmem:[#allocation2 + $0x8] sm:$0xfe]  ;;  %v317_v62 = vrot.slane %v279_v43, 1 }
 0x11a   :  { %v480_v39 = vld [vmem:[#allocation2 + $0x8] sm:$0xf8]  ;;  %240 = vst.msk [vmem:[#allocation2 + $0x28] sm:$0xff] %vm235_vm0, %v225_v32  ;;  %v213_v41 = vmin.f32 %v199_v33, 6.0  ;;  %v178_v42 = vadd.f32 %v177_v37, %v2310_v54  ;;  %v479_v44 = vld [vmem:[#allocation2] sm:$0xf8]  ;;  %v1917_v33 = vpack.c.bf16 %v867_v18, %v866_v17 }
 0x11b   :  { %v2352_v47 = vmul.f32 0.16666667, %v212_v35  ;;  %v200_v48 = vmax.f32 %v176_v36, 0.0  ;;  %v320_v56 = vrot.slane %v280_v38, 1  ;;  %v510_v57 = vrot.slane %v480_v39, 3  ;;  %v678_v34 = vld [vmem:[#allocation3 + $0x2f0] sm:$0xff] }
 0x11c   :  { %v227_v51 = vmul.f32 0.16666667, %v213_v41  ;;  %v201_v52 = vmax.f32 %v178_v42, 0.0  ;;  %v181_v55 = vpop.f32.mrb[10].mxu0  ;;  %v507_v63 = vrot.slane %v479_v44, 3  ;;  %v323_v9 = vrot.slane %v2334_v27, 1 }
 0x11d   :  { %241 = vst [vmem:[#allocation2 + $0x30] sm:$0xff] %v2352_v47  ;;  %v214_v58 = vmin.f32 %v200_v48, 6.0  ;;  %v182_v59 = vadd.f32 %v181_v55, %v2308_v53  ;;  %v183_v60 = vpop.f32.mrb[11].mxu0  ;;  %v2358_v61 = vld [vmem:[#allocation2 + $0x18] sm:$0xff]  ;;  %v513_v10 = vrot.slane %v2334_v27, 3  ;;  %v319_v0 = vsel %vm316_vm1, %v317_v62, %v318_v49  ;;  %v679_v38 = vld [vmem:[#allocation3 + $0x2f8] sm:$0xff] }
 0x11e   :  { %242 = vst.msk [vmem:[#allocation2 + $0x38] sm:$0xff] %vm235_vm0, %v227_v51  ;;  %v215_v2 = vmin.f32 %v201_v52, 6.0  ;;  %v184_v3 = vadd.f32 %v183_v60, %v2310_v54  ;;  %v321_v4 = vrot.slane %v2358_v61, 1  ;;  %v511_v6 = vrot.slane %v2358_v61, 3  ;;  %v868_v39 = vld [vmem:[#allocation3 + $0x410] sm:$0xff]  ;;  %v681_v60 = vld [vmem:[#allocation3 + $0x308] sm:$0xff] }
 0x11f   :  { %v2364_v7 = vmul.f32 0.16666667, %v214_v58  ;;  %v202_v8 = vmax.f32 %v182_v59, 0.0  ;;  %v509_v22 = vsel %vm506_vm2, %v507_v63, %v508_v50  ;;  %v324_v32 = vsel %vm316_vm1, %v318_v49, %v323_v9  ;;  %v870_v62 = vld [vmem:[#allocation3 + $0x420] sm:$0xff]  ;;  %v871_v63 = vld [vmem:[#allocation3 + $0x428] sm:$0xff] }
 0x120   :  { %v229_v11 = vmul.f32 0.16666667, %v215_v2  ;;  %v203_v12 = vmax.f32 %v184_v3, 0.0  ;;  %v187_v13 = vpop.f32.mrb[12].mxu0  ;;  %v322_v14 = vsel %vm316_vm1, %v320_v56, %v321_v4  ;;  %v512_v16 = vsel %vm506_vm2, %v510_v57, %v511_v6  ;;  %v680_v56 = vld [vmem:[#allocation3 + $0x300] sm:$0xff] }
 0x121   :  { %243 = vst [vmem:[#allocation2 + $0x40] sm:$0xff] %v2364_v7  ;;  %v216_v19 = vmin.f32 %v202_v8, 6.0  ;;  %v188_v20 = vadd.f32 %v187_v13, %v2308_v53  ;;  %v189_v21 = vpop.f32.mrb[13].mxu0  ;;  %1745 = vmatprep.mubr.msk.f32.mxu1 %vm235_vm0, %v322_v14  ;;  %1751 = vmatprep.mubr.msk.f32.mxu0 %vm235_vm0, %v512_v16  ;;  %v2378_v23 = vld [vmem:[#allocation2 + $0x28] sm:$0xff]  ;;  %v514_v42 = vsel %vm506_vm2, %v508_v50, %v513_v10  ;;  %v327_v44 = vrot.slane %v2352_v47, 1  ;;  %v872_v14 = vld [vmem:[#allocation3 + $0x430] sm:$0xff] }
 0x122   :  { %244 = vst.msk [vmem:[#allocation2 + $0x48] sm:$0xff] %vm235_vm0, %v229_v11  ;;  %v217_v24 = vmin.f32 %v203_v12, 6.0  ;;  %v190_v25 = vadd.f32 %v189_v21, %v2310_v54  ;;  %426 = vmatmul.mubr.f32.vlgmr.msra.gmra.mrb[0].mxu1 %v319_v0  ;;  %616 = vmatmul.mubr.f32.vlgmr.msra.gmra.mrb[14].mxu0 %v509_v22  ;;  %v325_v53 = vrot.slane %v2378_v23, 1  ;;  %v515_v26 = vrot.slane %v2378_v23, 3  ;;  %v682_v11 = vld [vmem:[#allocation3 + $0x310] sm:$0xff]  ;;  %v683_v13 = vld [vmem:[#allocation3 + $0x318] sm:$0xff] }
 0x123   :  { %v2384_v28 = vmul.f32 0.16666667, %v216_v19  ;;  %v204_v29 = vmax.f32 %v188_v20, 0.0  ;;  %1888 = vmatpush1.bf16.msra.mxu1 %v1887_v40  ;;  %1915 = vmatpush1.bf16.msra.mxu0 %v1914_v45  ;;  %v869_v40 = vld [vmem:[#allocation3 + $0x418] sm:$0xff]  ;;  %v517_v45 = vrot.slane %v2352_v47, 3  ;;  %v1893_v50 = vpack.c.bf16 %v679_v38, %v678_v34 }
 0x124   :  { %v231_v35 = vmul.f32 0.16666667, %v217_v24  ;;  %v205_v36 = vmax.f32 %v190_v25, 0.0  ;;  %v326_v54 = vsel %vm316_vm1, %v321_v4, %v325_v53  ;;  %v516_v37 = vsel %vm506_vm2, %v511_v6, %v515_v26  ;;  %1889 = vmatprep.subr.bf16.mxu1 %v2118_v1  ;;  %1916 = vmatprep.subr.bf16.mxu0 %v2118_v1  ;;  %v873_v16 = vld [vmem:[#allocation3 + $0x438] sm:$0xff] }
 0x125   :  { %245 = vst [vmem:[#allocation2 + $0x50] sm:$0xff] %v2384_v28  ;;  %v218_v41 = vmin.f32 %v204_v29, 6.0  ;;  %1746 = vmatprep.mubr.msk.f32.mxu1 %vm235_vm0, %v326_v54  ;;  %1752 = vmatprep.mubr.msk.f32.mxu0 %vm235_vm0, %v516_v37  ;;  %v2401_v43 = vld [vmem:[#allocation2 + $0x38] sm:$0xff]  ;;  %v1920_v55 = vpack.c.bf16 %v869_v40, %v868_v39  ;;  %v328_v30 = vsel %vm316_vm1, %v323_v9, %v327_v44  ;;  %v331_v2 = vrot.slane %v2364_v7, 1  ;;  %v874_v29 = vld [vmem:[#allocation3 + $0x440] sm:$0xff] }
 0x126   :  { %246 = vst.msk [vmem:[#allocation2 + $0x58] sm:$0xff] %vm235_vm0, %v231_v35  ;;  %v219_v48 = vmin.f32 %v205_v36, 6.0  ;;  %431 = vmatmul.mubr.f32.gmra.mrb[2].mxu1 %v324_v32  ;;  %621 = vmatmul.mubr.f32.gmra.mrb[16].mxu0 %v514_v42  ;;  %v329_v49 = vrot.slane %v2401_v43, 1  ;;  %v519_v51 = vrot.slane %v2401_v43, 3  ;;  %v518_v31 = vsel %vm506_vm2, %v513_v10, %v517_v45  ;;  %v875_v36 = vld [vmem:[#allocation3 + $0x448] sm:$0xff] }
 0x127   :  { %v2408_v52 = vmul.f32 0.16666667, %v218_v41  ;;  %1891 = vmatpush1.bf16.msra.mxu1 %v1890_v46  ;;  %1918 = vmatpush1.bf16.msra.mxu0 %v1917_v33  ;;  %v521_v3 = vrot.slane %v2364_v7, 3  ;;  %v1896_v8 = vpack.c.bf16 %v681_v60, %v680_v56  ;;  %v1923_v9 = vpack.c.bf16 %v871_v63, %v870_v62  ;;  %v686_v56 = vld [vmem:[#allocation3 + $0x330] sm:$0xff]  ;;  %v877_v62 = vld [vmem:[#allocation3 + $0x458] sm:$0xff] }
 0x128   :  { %v233_v57 = vmul.f32 0.16666667, %v219_v48  ;;  %v330_v58 = vsel %vm316_vm1, %v325_v53, %v329_v49  ;;  %v520_v59 = vsel %vm506_vm2, %v515_v26, %v519_v51  ;;  %1892 = vmatprep.subr.bf16.mxu1 %v2118_v1  ;;  %1919 = vmatprep.subr.bf16.mxu0 %v2118_v1  ;;  %v332_v17 = vsel %vm316_vm1, %v327_v44, %v331_v2  ;;  %v684_v53 = vld [vmem:[#allocation3 + $0x320] sm:$0xff]  ;;  %v685_v26 = vld [vmem:[#allocation3 + $0x328] sm:$0xff]  ;;  %v860_v48 = vld [vmem:[#allocation2 + $0x8] sm:$0x80] }
 0x129   :  { %247 = vst [vmem:[#allocation2 + $0x60] sm:$0xff] %v2408_v52  ;;  %1747 = vmatprep.mubr.msk.f32.mxu1 %vm235_vm0, %v330_v58  ;;  %1753 = vmatprep.mubr.msk.f32.mxu0 %vm235_vm0, %v520_v59  ;;  %v2426_v46 = vld [vmem:[#allocation2 + $0x48] sm:$0xff]  ;;  %v522_v18 = vsel %vm506_vm2, %v517_v45, %v521_v3  ;;  %v335_v20 = vrot.slane %v2384_v28, 1  ;;  %v525_v21 = vrot.slane %v2384_v28, 3  ;;  %v1899_v24 = vpack.c.bf16 %v683_v13, %v682_v11  ;;  %v876_v60 = vld [vmem:[#allocation3 + $0x450] sm:$0xff]  ;;  %v689_v11 = vld [vmem:[#allocation3 + $0x348] sm:$0xff] }
 0x12a   :  { %248 = vst.msk [vmem:[#allocation2 + $0x68] sm:$0xff] %vm235_vm0, %v233_v57  ;;  %436 = vmatmul.mubr.f32.gmra.mrb[4].mxu1 %v328_v30  ;;  %626 = vmatmul.mubr.f32.gmra.mrb[18].mxu0 %v518_v31  ;;  %v333_v4 = vrot.slane %v2426_v46, 1  ;;  %v523_v6 = vrot.slane %v2426_v46, 3  ;;  %v1926_v25 = vpack.c.bf16 %v873_v16, %v872_v14  ;;  %v670_v45 = vld [vmem:[#allocation2 + $0x8] sm:$0xe0]  ;;  %v690_v16 = vld [vmem:[#allocation3 + $0x350] sm:$0xff] }
 0x12b   :  { %1894 = vmatpush1.bf16.msra.mxu1 %v1893_v50  ;;  %1921 = vmatpush1.bf16.msra.mxu0 %v1920_v55  ;;  %v336_v54 = vsel %vm316_vm1, %v331_v2, %v335_v20  ;;  %v526_v37 = vsel %vm506_vm2, %v521_v3, %v525_v21  ;;  %v701_v50 = vrot.slane %v2358_v61, 5  ;;  %v891_v55 = vrot.slane %v2358_v61, 7  ;;  %v687_v57 = vld [vmem:[#allocation3 + $0x338] sm:$0xff] }
 0x12c   :  { %v334_v10 = vsel %vm316_vm1, %v329_v49, %v333_v4  ;;  %v524_v12 = vsel %vm506_vm2, %v519_v51, %v523_v6  ;;  %1895 = vmatprep.subr.bf16.mxu1 %v2118_v1  ;;  %1922 = vmatprep.subr.bf16.mxu0 %v2118_v1  ;;  %v1902_v49 = vpack.c.bf16 %v685_v26, %v684_v53  ;;  %v700_v31 = vrot.slane %v670_v45, 5  ;;  %v1032_v45 = vld [vmem:[#allocation3 + $0x498] sm:$0xff] }
 0x12d   :  { %1748 = vmatprep.mubr.msk.f32.mxu1 %vm235_vm0, %v334_v10  ;;  %1754 = vmatprep.mubr.msk.f32.mxu0 %vm235_vm0, %v524_v12  ;;  %v2441_v19 = vld [vmem:[#allocation2 + $0x58] sm:$0xff]  ;;  %v1929_v51 = vpack.c.bf16 %v875_v36, %v874_v29  ;;  %v890_v2 = vrot.slane %v860_v48, 7  ;;  %v1905_v3 = vpack.c.bf16 %v687_v57, %v686_v56  ;;  %v878_v10 = vld [vmem:[#allocation3 + $0x460] sm:$0xff]  ;;  %v698_v36 = vrot.slane %v2322_v15, 5  ;;  %v263_v48 = vld [vmem:[#allocation3 + $0x10] sm:$0xff] }
 0x12e   :  { %441 = vmatmul.mubr.f32.gmra.mrb[6].mxu1 %v332_v17  ;;  %631 = vmatmul.mubr.f32.gmra.mrb[20].mxu0 %v522_v18  ;;  %v337_v0 = vrot.slane %v2441_v19, 1  ;;  %v527_v22 = vrot.slane %v2441_v19, 3  ;;  %v879_v12 = vld [vmem:[#allocation3 + $0x468] sm:$0xff]  ;;  %v691_v17 = vld [vmem:[#allocation3 + $0x358] sm:$0xff]  ;;  %v880_v18 = vld [vmem:[#allocation3 + $0x470] sm:$0xff]  ;;  %v709_v57 = vrot.slane %v2401_v43, 5 }
 0x12f   :  { %1897 = vmatpush1.bf16.msra.mxu1 %v1896_v8  ;;  %1924 = vmatpush1.bf16.msra.mxu0 %v1923_v9  ;;  %v1932_v8 = vpack.c.bf16 %v877_v62, %v876_v60  ;;  %v688_v9 = vld [vmem:[#allocation3 + $0x340] sm:$0xff]  ;;  %v1935_v14 = vpack.c.bf16 %v879_v12, %v878_v10  ;;  %v1030_v29 = vld [vmem:[#allocation3 + $0x488] sm:$0xff]  ;;  %v1035_v12 = vld [vmem:[#allocation3 + $0x4b0] sm:$0xff] }
 0x130   :  { %v338_v32 = vsel %vm316_vm1, %v333_v4, %v337_v0  ;;  %v528_v33 = vsel %vm506_vm2, %v523_v6, %v527_v22  ;;  %1898 = vmatprep.subr.bf16.mxu1 %v2118_v1  ;;  %1925 = vmatprep.subr.bf16.mxu0 %v2118_v1  ;;  %v281_v34 = vld [vmem:[#allocation2 + $0x60] sm:$0x1]  ;;  %v702_v4 = vsel %vm696_vm3, %v700_v31, %v701_v50  ;;  %v1033_v62 = vld [vmem:[#allocation3 + $0x4a0] sm:$0xff]  ;;  %v1034_v31 = vld [vmem:[#allocation3 + $0x4a8] sm:$0xff] }
 0x131   :  { %v481_v35 = vld [vmem:[#allocation2 + $0x60] sm:$0x7]  ;;  %1749 = vmatprep.mubr.msk.f32.mxu1 %vm235_vm0, %v338_v32  ;;  %1755 = vmatprep.mubr.msk.f32.mxu0 %vm235_vm0, %v528_v33  ;;  %v282_v38 = vld [vmem:[#allocation2 + $0x68] sm:$0x1]  ;;  %v339_v40 = vrot.slane %v281_v34, 1  ;;  %v892_v6 = vsel %vm886_vm4, %v890_v2, %v891_v55  ;;  %v1908_v13 = vpack.c.bf16 %v689_v11, %v688_v9  ;;  %v261_v32 = vld [vmem:[#allocation3] sm:$0xff]  ;;  %v1947_v11 = vpack.c.bf16 %v1034_v31, %v1033_v62 }
 0x132   :  { %v482_v39 = vld [vmem:[#allocation2 + $0x68] sm:$0x7]  ;;  %v529_v41 = vrot.slane %v481_v35, 3  ;;  %446 = vmatmul.mubr.f32.gmra.mrb[8].mxu1 %v336_v54  ;;  %636 = vmatmul.mubr.f32.gmra.mrb[22].mxu0 %v526_v37  ;;  %v341_v42 = vrot.slane %v282_v38, 1  ;;  %v262_v33 = vld [vmem:[#allocation3 + $0x8] sm:$0xff]  ;;  %v705_v34 = vrot.slane %v2378_v23, 5 }
 0x133   :  { %v531_v44 = vrot.slane %v482_v39, 3  ;;  %1900 = vmatpush1.bf16.msra.mxu1 %v1899_v24  ;;  %1927 = vmatpush1.bf16.msra.mxu0 %v1926_v25  ;;  %v340_v63 = vsel %vm316_vm1, %v335_v20, %v339_v40  ;;  %v881_v20 = vld [vmem:[#allocation3 + $0x478] sm:$0xff]  ;;  %v1029_v25 = vld [vmem:[#allocation3 + $0x480] sm:$0xff]  ;;  %v895_v35 = vrot.slane %v2378_v23, 7  ;;  %v888_v54 = vrot.slane %v2322_v15, 7  ;;  %v1031_v39 = vld [vmem:[#allocation3 + $0x490] sm:$0xff] }
 0x134   :  { %v342_v58 = vsel %vm316_vm1, %v337_v0, %v341_v42  ;;  %1901 = vmatprep.subr.bf16.mxu1 %v2118_v1  ;;  %1928 = vmatprep.subr.bf16.mxu0 %v2118_v1  ;;  %v530_v30 = vsel %vm506_vm2, %v525_v21, %v529_v41  ;;  %v669_v21 = vld [vmem:[#allocation2] sm:$0xe0]  ;;  %v1938_v24 = vpack.c.bf16 %v881_v20, %v880_v18  ;;  %v703_v42 = vrot.slane %v2334_v27, 5  ;;  %v265_v2 = vld [vmem:[#allocation3 + $0x20] sm:$0xff]  ;;  %v1036_v18 = vld [vmem:[#allocation3 + $0x4b8] sm:$0xff] }
 0x135   :  { %v532_v59 = vsel %vm506_vm2, %v527_v22, %v531_v44  ;;  %1750 = vmatprep.mubr.msk.f32.mxu1 %vm235_vm0, %v342_v58  ;;  %v859_v0 = vld [vmem:[#allocation2] sm:$0x80]  ;;  %v1911_v22 = vpack.c.bf16 %v691_v17, %v690_v16  ;;  %v697_v53 = vrot.slane %v669_v21, 5  ;;  %v1941_v37 = vpack.c.bf16 %v1030_v29, %v1029_v25  ;;  %v268_v21 = vld [vmem:[#allocation3 + $0x38] sm:$0xff] }
 0x136   :  { %1756 = vmatprep.mubr.msk.f32.mxu0 %vm235_vm0, %v532_v59  ;;  %451 = vmatmul.mubr.f32.gmra.mrb[10].mxu1 %v340_v63  ;;  %v887_v26 = vrot.slane %v859_v0, 7  ;;  %v1968_v38 = vpack.c.bf16 %v262_v33, %v261_v32  ;;  %v893_v44 = vrot.slane %v2334_v27, 7  ;;  %v896_v56 = vsel %vm886_vm4, %v891_v55, %v895_v35  ;;  %v267_v20 = vld [vmem:[#allocation3 + $0x30] sm:$0xff]  ;;  %v1037_v33 = vld [vmem:[#allocation3 + $0x4c0] sm:$0xff]  ;;  %v1040_v62 = vld [vmem:[#allocation3 + $0x4d8] sm:$0xff] }
 0x137   :  { %641 = vmatmul.mubr.f32.gmra.mrb[24].mxu0 %v530_v30  ;;  %1903 = vmatpush1.bf16.msra.mxu1 %v1902_v49  ;;  %v699_v40 = vsel %vm696_vm3, %v697_v53, %v698_v36  ;;  %v264_v49 = vld [vmem:[#allocation3 + $0x18] sm:$0xff]  ;;  %v899_v58 = vrot.slane %v2401_v43, 7  ;;  %v1944_v59 = vpack.c.bf16 %v1032_v45, %v1031_v39  ;;  %v704_v63 = vsel %vm696_vm3, %v698_v36, %v703_v42  ;;  %v270_v39 = vld [vmem:[#allocation3 + $0x48] sm:$0xff]  ;;  %v671_v45 = vld [vmem:[#allocation2 + $0x60] sm:$0x1f] }
 0x138   :  { %1930 = vmatpush1.bf16.msra.mxu0 %v1929_v51  ;;  %1757 = vmatprep.mubr.msk.f32.mxu1 %vm235_vm0, %v702_v4  ;;  %v889_v41 = vsel %vm886_vm4, %v887_v26, %v888_v54  ;;  %v706_v51 = vsel %vm696_vm3, %v701_v50, %v705_v34  ;;  %v1971_v60 = vpack.c.bf16 %v264_v49, %v263_v48  ;;  %v707_v55 = vrot.slane %v2352_v47, 5  ;;  %v672_v53 = vld [vmem:[#allocation2 + $0x68] sm:$0x1f]  ;;  %v861_v48 = vld [vmem:[#allocation2 + $0x60] sm:$0x7f] }
 0x139   :  { %1763 = vmatprep.mubr.msk.f32.mxu0 %vm235_vm0, %v892_v6  ;;  %1904 = vmatprep.subr.bf16.mxu1 %v2118_v1  ;;  %v894_v50 = vsel %vm886_vm4, %v888_v54, %v893_v44  ;;  %v897_v30 = vrot.slane %v2352_v47, 7  ;;  %v710_v4 = vsel %vm696_vm3, %v705_v34, %v709_v57  ;;  %v900_v6 = vsel %vm886_vm4, %v895_v35, %v899_v58  ;;  %v862_v26 = vld [vmem:[#allocation2 + $0x68] sm:$0x7f] }
 0x13a   :  { %1931 = vmatprep.subr.bf16.mxu0 %v2118_v1  ;;  %v903_v9 = vrot.slane %v2426_v46, 7  ;;  %v711_v16 = vrot.slane %v2364_v7, 5  ;;  %v901_v17 = vrot.slane %v2364_v7, 7  ;;  %v907_v25 = vrot.slane %v2441_v19, 7 }
 0x13b   :  { %1906 = vmatpush1.bf16.msra.mxu1 %v1905_v3  ;;  %v266_v3 = vld [vmem:[#allocation3 + $0x28] sm:$0xff]  ;;  %v1950_v29 = vpack.c.bf16 %v1036_v18, %v1035_v12  ;;  %v1977_v32 = vpack.c.bf16 %v268_v21, %v267_v20  ;;  %v715_v36 = vrot.slane %v2384_v28, 5  ;;  %v905_v54 = vrot.slane %v2384_v28, 7  ;;  %v276_v18 = vld [vmem:[#allocation3 + $0x78] sm:$0xff] }
 0x13c   :  { %1933 = vmatpush1.bf16.msra.mxu0 %v1932_v8  ;;  %1907 = vmatprep.subr.bf16.mxu1 %v2118_v1  ;;  %v713_v8 = vrot.slane %v2426_v46, 5  ;;  %v1974_v10 = vpack.c.bf16 %v266_v3, %v265_v2  ;;  %v712_v34 = vsel %vm696_vm3, %v707_v55, %v711_v16  ;;  %v902_v35 = vsel %vm886_vm4, %v897_v30, %v901_v17  ;;  %v1041_v3 = vld [vmem:[#allocation3 + $0x4e0] sm:$0xff] }
 0x13d   :  { %1934 = vmatprep.subr.bf16.mxu0 %v2118_v1 }
 0x13e   :  { %v714_v0 = vsel %vm696_vm3, %v709_v57, %v713_v8  ;;  %v716_v57 = vsel %vm696_vm3, %v711_v16, %v715_v36  ;;  %v1044_v16 = vld [vmem:[#allocation3 + $0x4f8] sm:$0xff] }
 0x13f   :  { %1909 = vmatpush1.bf16.msra.mxu1 %v1908_v13  ;;  %v708_v13 = vsel %vm696_vm3, %v703_v42, %v707_v55  ;;  %v721_v42 = vrot.slane %v672_v53, 5 }
 0x140   :  { %1936 = vmatpush1.bf16.msra.mxu0 %v1935_v14  ;;  %1910 = vmatprep.subr.bf16.mxu1 %v2118_v1  ;;  %v898_v14 = vsel %vm886_vm4, %v893_v44, %v897_v30  ;;  %v911_v44 = vrot.slane %v862_v26, 7 }
 0x141   :  { %1937 = vmatprep.subr.bf16.mxu0 %v2118_v1 }
 0x142   :  { %v912_v30 = vsel %vm886_vm4, %v907_v25, %v911_v44  ;;  %v466_v44 = vld [vmem:[#allocation3 + $0x148] sm:$0xff] }
 0x143   :  { %1912 = vmatpush1.bf16.msra.mxu1 %v1911_v22  ;;  %v904_v22 = vsel %vm886_vm4, %v899_v58, %v903_v9  ;;  %v906_v58 = vsel %vm886_vm4, %v901_v17, %v905_v54  ;;  %v275_v17 = vld [vmem:[#allocation3 + $0x70] sm:$0xff] }
 0x144   :  { %1939 = vmatpush1.bf16.msra.mxu0 %v1938_v24  ;;  %1940 = vmatprep.subr.bf16.mxu1 %v2118_v1  ;;  %v717_v24 = vrot.slane %v2441_v19, 5  ;;  %v1989_v21 = vpack.c.bf16 %v276_v18, %v275_v17  ;;  %v664_v17 = vld [vmem:[#allocation3 + $0x2a8] sm:$0xff] }
 0x145   :  { %1967 = vmatprep.subr.bf16.mxu0 %v2118_v1 }
 0x146   :  { %806 = vmatmul.mubr.f32.vlgmr.msra.gmra.mrb[12].mxu1 %v699_v40  ;;  %v718_v40 = vsel %vm696_vm3, %v713_v8, %v717_v24  ;;  %v722_v55 = vsel %vm696_vm3, %v717_v24, %v721_v42  ;;  %v1042_v8 = vld [vmem:[#allocation3 + $0x4e8] sm:$0xff]  ;;  %v277_v24 = vld [vmem:[#allocation3 + $0x80] sm:$0xff] }
 0x147   :  { %996 = vmatmul.mubr.f32.vlgmr.msra.gmra.mrb[26].mxu0 %v889_v41  ;;  %1758 = vmatprep.mubr.msk.f32.mxu1 %vm235_vm0, %v706_v51  ;;  %v908_v41 = vsel %vm886_vm4, %v903_v9, %v907_v25  ;;  %v273_v9 = vld [vmem:[#allocation3 + $0x60] sm:$0xff]  ;;  %v1959_v12 = vpack.c.bf16 %v1042_v8, %v1041_v3  ;;  %v278_v25 = vld [vmem:[#allocation3 + $0x88] sm:$0xff]  ;;  %v457_v3 = vld [vmem:[#allocation2 + $0x8] sm:$0xfc]  ;;  %v1262_v8 = vrot.slane %v2358_v61, 2 }
 0x148   :  { %1764 = vmatprep.mubr.msk.f32.mxu0 %vm235_vm0, %v896_v56  ;;  %1942 = vmatpush1.bf16.msra.mxu1 %v1941_v37  ;;  %v1038_v37 = vld [vmem:[#allocation3 + $0x4c8] sm:$0xff]  ;;  %v1039_v56 = vld [vmem:[#allocation3 + $0x4d0] sm:$0xff]  ;;  %v1992_v26 = vpack.c.bf16 %v278_v25, %v277_v24  ;;  %v465_v42 = vld [vmem:[#allocation3 + $0x140] sm:$0xff] }
 0x149   :  { %1969 = vmatpush1.bf16.msra.mxu0 %v1968_v38  ;;  %1943 = vmatprep.subr.bf16.mxu1 %v2118_v1  ;;  %v269_v38 = vld [vmem:[#allocation3 + $0x40] sm:$0xff]  ;;  %v1953_v49 = vpack.c.bf16 %v1038_v37, %v1037_v33  ;;  %v1956_v31 = vpack.c.bf16 %v1040_v62, %v1039_v56  ;;  %v464_v37 = vld [vmem:[#allocation3 + $0x138] sm:$0xff]  ;;  %v470_v62 = vld [vmem:[#allocation3 + $0x168] sm:$0xff] }
 0x14a   :  { %1970 = vmatprep.subr.bf16.mxu0 %v2118_v1  ;;  %811 = vmatmul.mubr.f32.gmra.mrb[14].mxu1 %v704_v63  ;;  %v1980_v51 = vpack.c.bf16 %v270_v39, %v269_v38  ;;  %v271_v63 = vld [vmem:[#allocation3 + $0x50] sm:$0xff]  ;;  %v651_v33 = vld [vmem:[#allocation3 + $0x240] sm:$0xff]  ;;  %v654_v39 = vld [vmem:[#allocation3 + $0x258] sm:$0xff] }
 0x14b   :  { %1001 = vmatmul.mubr.f32.gmra.mrb[28].mxu0 %v894_v50  ;;  %1759 = vmatprep.mubr.msk.f32.mxu1 %vm235_vm0, %v710_v4  ;;  %v272_v50 = vld [vmem:[#allocation3 + $0x58] sm:$0xff]  ;;  %v653_v38 = vld [vmem:[#allocation3 + $0x250] sm:$0xff] }
 0x14c   :  { %1765 = vmatprep.mubr.msk.f32.mxu0 %vm235_vm0, %v900_v6  ;;  %1945 = vmatpush1.bf16.msra.mxu1 %v1944_v59  ;;  %v719_v59 = vrot.slane %v671_v45, 5  ;;  %v1983_v2 = vpack.c.bf16 %v272_v50, %v271_v63  ;;  %v655_v45 = vld [vmem:[#allocation3 + $0x260] sm:$0xff]  ;;  %v468_v56 = vld [vmem:[#allocation3 + $0x158] sm:$0xff]  ;;  %v660_v50 = vld [vmem:[#allocation3 + $0x288] sm:$0xff] }
 0x14d   :  { %1972 = vmatpush1.bf16.msra.mxu0 %v1971_v60  ;;  %1946 = vmatprep.subr.bf16.mxu1 %v2118_v1  ;;  %v909_v60 = vrot.slane %v861_v48, 7  ;;  %v656_v48 = vld [vmem:[#allocation3 + $0x268] sm:$0xff]  ;;  %v659_v63 = vld [vmem:[#allocation3 + $0x280] sm:$0xff]  ;;  %v665_v24 = vld [vmem:[#allocation3 + $0x2b0] sm:$0xff] }
 0x14e   :  { %1973 = vmatprep.subr.bf16.mxu0 %v2118_v1  ;;  %816 = vmatmul.mubr.f32.gmra.mrb[16].mxu1 %v708_v13  ;;  %v720_v4 = vsel %vm696_vm3, %v715_v36, %v719_v59  ;;  %v666_v25 = vld [vmem:[#allocation3 + $0x2b8] sm:$0xff] }
 0x14f   :  { %1006 = vmatmul.mubr.f32.gmra.mrb[30].mxu0 %v898_v14  ;;  %1760 = vmatprep.mubr.msk.f32.mxu1 %vm235_vm0, %v714_v0  ;;  %v910_v6 = vsel %vm886_vm4, %v905_v54, %v909_v60  ;;  %v1043_v14 = vld [vmem:[#allocation3 + $0x4f0] sm:$0xff]  ;;  %v1045_v0 = vld [vmem:[#allocation3 + $0x500] sm:$0xff] }
 0x150   :  { %1766 = vmatprep.mubr.msk.f32.mxu0 %vm235_vm0, %v904_v22  ;;  %1948 = vmatpush1.bf16.msra.mxu1 %v1947_v11  ;;  %v274_v11 = vld [vmem:[#allocation3 + $0x68] sm:$0xff]  ;;  %v1962_v20 = vpack.c.bf16 %v1044_v16, %v1043_v14  ;;  %v463_v54 = vld [vmem:[#allocation3 + $0x130] sm:$0xff]  ;;  %v469_v60 = vld [vmem:[#allocation3 + $0x160] sm:$0xff] }
 0x151   :  { %1975 = vmatpush1.bf16.msra.mxu0 %v1974_v10  ;;  %1949 = vmatprep.subr.bf16.mxu1 %v2118_v1  ;;  %v250_v10 = vld [vmem:[#allocation2 + $0x8] sm:$0xff]  ;;  %v1986_v13 = vpack.c.bf16 %v274_v11, %v273_v9  ;;  %v1046_v22 = vld [vmem:[#allocation3 + $0x508] sm:$0xff]  ;;  %v1406_v9 = vrot.slane %v2358_v61, 4  ;;  %v473_v14 = vld [vmem:[#allocation3 + $0x180] sm:$0xff] }
 0x152   :  { %1976 = vmatprep.subr.bf16.mxu0 %v2118_v1  ;;  %821 = vmatmul.mubr.f32.gmra.mrb[18].mxu1 %v712_v34  ;;  %v1965_v53 = vpack.c.bf16 %v1046_v22, %v1045_v0  ;;  %v652_v34 = vld [vmem:[#allocation3 + $0x248] sm:$0xff]  ;;  %v663_v16 = vld [vmem:[#allocation3 + $0x2a0] sm:$0xff]  ;;  %v475_v22 = vld [vmem:[#allocation3 + $0x190] sm:$0xff] }
 0x153   :  { %1011 = vmatmul.mubr.f32.gmra.mrb[32].mxu0 %v902_v35  ;;  %1761 = vmatprep.mubr.msk.f32.mxu1 %vm235_vm0, %v718_v40  ;;  %v2022_v36 = vpack.c.bf16 %v652_v34, %v651_v33  ;;  %v1998_v40 = vpack.c.bf16 %v464_v37, %v463_v54  ;;  %v2040_v0 = vpack.c.bf16 %v664_v17, %v663_v16  ;;  %v667_v33 = vld [vmem:[#allocation3 + $0x2c0] sm:$0xff]  ;;  %v668_v34 = vld [vmem:[#allocation3 + $0x2c8] sm:$0xff] }
 0x154   :  { %1767 = vmatprep.mubr.msk.f32.mxu0 %vm235_vm0, %v908_v41  ;;  %1951 = vmatpush1.bf16.msra.mxu1 %v1950_v29  ;;  %v461_v29 = vld [vmem:[#allocation3 + $0x120] sm:$0xff]  ;;  %v2025_v41 = vpack.c.bf16 %v654_v39, %v653_v38  ;;  %v2046_v37 = vpack.c.bf16 %v668_v34, %v667_v33 }
 0x155   :  { %1978 = vmatpush1.bf16.msra.mxu0 %v1977_v32  ;;  %1952 = vmatprep.subr.bf16.mxu1 %v2118_v1  ;;  %v462_v32 = vld [vmem:[#allocation3 + $0x128] sm:$0xff] }
 0x156   :  { %1979 = vmatprep.subr.bf16.mxu0 %v2118_v1  ;;  %826 = vmatmul.mubr.f32.gmra.mrb[20].mxu1 %v716_v57  ;;  %v1995_v35 = vpack.c.bf16 %v462_v32, %v461_v29  ;;  %v657_v57 = vld [vmem:[#allocation3 + $0x270] sm:$0xff]  ;;  %v477_v29 = vld [vmem:[#allocation3 + $0x1a0] sm:$0xff]  ;;  %v478_v32 = vld [vmem:[#allocation3 + $0x1a8] sm:$0xff] }
 0x157   :  { %1016 = vmatmul.mubr.f32.gmra.mrb[34].mxu0 %v906_v58  ;;  %1762 = vmatprep.mubr.msk.f32.mxu1 %vm235_vm0, %v722_v55  ;;  %v658_v58 = vld [vmem:[#allocation3 + $0x278] sm:$0xff]  ;;  %v2034_v55 = vpack.c.bf16 %v660_v50, %v659_v63  ;;  %v2019_v54 = vpack.c.bf16 %v478_v32, %v477_v29  ;;  %v1270_v63 = vrot.slane %v2401_v43, 2  ;;  %v1414_v50 = vrot.slane %v2401_v43, 4 }
 0x158   :  { %1768 = vmatprep.mubr.msk.f32.mxu0 %vm235_vm0, %v912_v30  ;;  %1954 = vmatpush1.bf16.msra.mxu1 %v1953_v49  ;;  %v2028_v49 = vpack.c.bf16 %v656_v48, %v655_v45  ;;  %v2031_v59 = vpack.c.bf16 %v658_v58, %v657_v57  ;;  %v471_v30 = vld [vmem:[#allocation3 + $0x170] sm:$0xff]  ;;  %v2615_v45 = vld [vmem:[#allocation2 + $0x10] sm:$0xff] }
 0x159   :  { %1981 = vmatpush1.bf16.msra.mxu0 %v1980_v51  ;;  %1955 = vmatprep.subr.bf16.mxu1 %v2118_v1  ;;  %v467_v51 = vld [vmem:[#allocation3 + $0x150] sm:$0xff]  ;;  %v1259_v48 = vrot.slane %v2615_v45, 2 }
 0x15a   :  { %1982 = vmatprep.subr.bf16.mxu0 %v2118_v1  ;;  %831 = vmatmul.mubr.f32.gmra.mrb[22].mxu1 %v720_v4  ;;  %v662_v4 = vld [vmem:[#allocation3 + $0x298] sm:$0xff]  ;;  %v2622_v57 = vld [vmem:[#allocation2 + $0x20] sm:$0xff] }
 0x15b   :  { %1021 = vmatmul.mubr.f32.gmra.mrb[36].mxu0 %v910_v6  ;;  %1769 = vmatprep.mubr.msk.f32.mxu1 %vm235_vm0, %v2358_v61  ;;  %v1027_v6 = vld [vmem:[#allocation2 + $0x68] sm:$0xff]  ;;  %v1264_v58 = vrot.slane %v2622_v57, 2 }
 0x15c   :  { %1775 = vmatprep.mubr.msk.f32.mxu0 %vm235_vm0, %v250_v10  ;;  %1957 = vmatpush1.bf16.msra.mxu1 %v1956_v31  ;;  %v472_v31 = vld [vmem:[#allocation3 + $0x178] sm:$0xff]  ;;  %v1261_v10 = vrot.slane %v457_v3, 2  ;;  %v845_v3 = vld [vmem:[#allocation3 + $0x380] sm:$0xff] }
 0x15d   :  { %1984 = vmatpush1.bf16.msra.mxu0 %v1983_v2  ;;  %1958 = vmatprep.subr.bf16.mxu1 %v2118_v1  ;;  %v661_v2 = vld [vmem:[#allocation3 + $0x290] sm:$0xff]  ;;  %v2010_v11 = vpack.c.bf16 %v472_v31, %v471_v30  ;;  %v2639_v31 = vld [vmem:[#allocation2 + $0x30] sm:$0xff] }
 0x15e   :  { %1985 = vmatprep.subr.bf16.mxu0 %v2118_v1  ;;  %v1263_v18 = vsel %vm1257_vm5, %v1261_v10, %v1262_v8 }
 0x160   :  { %1960 = vmatpush1.bf16.msra.mxu1 %v1959_v12  ;;  %v2037_v12 = vpack.c.bf16 %v662_v4, %v661_v2  ;;  %v1412_v2 = vrot.slane %v2639_v31, 4 }
 0x161   :  { %1987 = vmatpush1.bf16.msra.mxu0 %v1986_v13  ;;  %1961 = vmatprep.subr.bf16.mxu1 %v2118_v1 }
 0x162   :  { %1988 = vmatprep.subr.bf16.mxu0 %v2118_v1 }
 0x164   :  { %1963 = vmatpush1.bf16.msra.mxu1 %v1962_v20 }
 0x165   :  { %1990 = vmatpush1.bf16.msra.mxu0 %v1989_v21  ;;  %1964 = vmatprep.subr.bf16.mxu1 %v2118_v1 }
 0x166   :  { %1991 = vmatprep.subr.bf16.mxu0 %v2118_v1 }
 0x168   :  { %1966 = vmatpush1.bf16.msra.mxu1 %v1965_v53 }
 0x169   :  { %1993 = vmatpush1.bf16.msra.mxu0 %v1992_v26  ;;  %1994 = vmatprep.subr.bf16.mxu1 %v2118_v1  ;;  %v2043_v26 = vpack.c.bf16 %v666_v25, %v665_v24  ;;  %v1276_v25 = vrot.slane %v2384_v28, 2 }
 0x16a   :  { %2021 = vmatprep.subr.bf16.mxu0 %v2118_v1 }
 0x16b   :  { %1125 = vmatmul.mubr.f32.vlgmr.msra.gmra.mrb[24].mxu1 %v2322_v15 }
 0x16c   :  { %1223 = vmatmul.mubr.f32.vlgmr.msra.gmra.mrb[38].mxu0 %v2316_v5  ;;  %1770 = vmatprep.mubr.msk.f32.mxu1 %vm235_vm0, %v2378_v23  ;;  %v2001_v5 = vpack.c.bf16 %v466_v44, %v465_v42  ;;  %v1266_v42 = vrot.slane %v2378_v23, 2  ;;  %v1410_v44 = vrot.slane %v2378_v23, 4 }
 0x16d   :  { %1776 = vmatprep.mubr.msk.f32.mxu0 %vm235_vm0, %v2358_v61  ;;  %1996 = vmatpush1.bf16.msra.mxu1 %v1995_v35  ;;  %v456_v35 = vld [vmem:[#allocation2] sm:$0xfc]  ;;  %v1268_v61 = vrot.slane %v2639_v31, 2 }
 0x16e   :  { %2023 = vmatpush1.bf16.msra.mxu0 %v2022_v36  ;;  %1997 = vmatprep.subr.bf16.mxu1 %v2118_v1  ;;  %v646_v36 = vld [vmem:[#allocation2] sm:$0xf0]  ;;  %v1258_v38 = vrot.slane %v456_v35, 2  ;;  %v1271_v4 = vsel %vm1257_vm5, %v1266_v42, %v1270_v63  ;;  %v458_v35 = vld [vmem:[#allocation2 + $0x60] sm:$0x3] }
 0x16f   :  { %2024 = vmatprep.subr.bf16.mxu0 %v2118_v1  ;;  %1130 = vmatmul.mubr.f32.gmra.mrb[26].mxu1 %v2334_v27  ;;  %v1402_v39 = vrot.slane %v646_v36, 4  ;;  %v648_v36 = vld [vmem:[#allocation2 + $0x60] sm:$0xf] }
 0x170   :  { %1228 = vmatmul.mubr.f32.gmra.mrb[40].mxu0 %v2322_v15  ;;  %1771 = vmatprep.mubr.msk.f32.mxu1 %vm235_vm0, %v2401_v43  ;;  %v2004_v15 = vpack.c.bf16 %v468_v56, %v467_v51  ;;  %v1260_v51 = vsel %vm1257_vm5, %v1258_v38, %v1259_v48  ;;  %v1280_v38 = vrot.slane %v458_v35, 2 }
 0x171   :  { %1777 = vmatprep.mubr.msk.f32.mxu0 %vm235_vm0, %v2378_v23  ;;  %1999 = vmatpush1.bf16.msra.mxu1 %v1998_v40  ;;  %v841_v40 = vld [vmem:[#allocation3 + $0x360] sm:$0xff]  ;;  %v1408_v23 = vrot.slane %v2622_v57, 4 }
 0x172   :  { %2026 = vmatpush1.bf16.msra.mxu0 %v2025_v41  ;;  %2000 = vmatprep.subr.bf16.mxu1 %v2118_v1  ;;  %v842_v41 = vld [vmem:[#allocation3 + $0x368] sm:$0xff] }
 0x173   :  { %2027 = vmatprep.subr.bf16.mxu0 %v2118_v1  ;;  %1135 = vmatmul.mubr.f32.gmra.mrb[28].mxu1 %v2352_v47  ;;  %v1413_v10 = vsel %vm1401_vm6, %v1408_v23, %v1412_v2 }
 0x174   :  { %1233 = vmatmul.mubr.f32.gmra.mrb[42].mxu0 %v2334_v27  ;;  %1772 = vmatprep.mubr.msk.f32.mxu1 %vm235_vm0, %v2426_v46  ;;  %v2007_v27 = vpack.c.bf16 %v470_v62, %v469_v60  ;;  %v1267_v60 = vsel %vm1257_vm5, %v1262_v8, %v1266_v42  ;;  %v1411_v62 = vsel %vm1401_vm6, %v1406_v9, %v1410_v44  ;;  %v1418_v8 = vrot.slane %v2426_v46, 4  ;;  %v837_v42 = vld [vmem:[#allocation2 + $0x8] sm:$0xc0] }
 0x175   :  { %1778 = vmatprep.mubr.msk.f32.mxu0 %vm235_vm0, %v2401_v43  ;;  %2002 = vmatpush1.bf16.msra.mxu1 %v2001_v5  ;;  %v1403_v5 = vrot.slane %v2615_v45, 4  ;;  %v846_v43 = vld [vmem:[#allocation3 + $0x388] sm:$0xff] }
 0x176   :  { %2029 = vmatpush1.bf16.msra.mxu0 %v2028_v49  ;;  %2003 = vmatprep.subr.bf16.mxu1 %v2118_v1  ;;  %v2049_v49 = vpack.c.bf16 %v842_v41, %v841_v40  ;;  %v1419_v17 = vsel %vm1401_vm6, %v1414_v50, %v1418_v8  ;;  %v851_v40 = vld [vmem:[#allocation3 + $0x3b0] sm:$0xff]  ;;  %v852_v41 = vld [vmem:[#allocation3 + $0x3b8] sm:$0xff] }
 0x177   :  { %2030 = vmatprep.subr.bf16.mxu0 %v2118_v1  ;;  %1140 = vmatmul.mubr.f32.gmra.mrb[30].mxu1 %v2364_v7  ;;  %v1404_v56 = vsel %vm1401_vm6, %v1402_v39, %v1403_v5  ;;  %v1409_v30 = vsel %vm1401_vm6, %v1403_v5, %v1408_v23  ;;  %v1424_v39 = vrot.slane %v648_v36, 4  ;;  %v2084_v5 = vld [vmem:[#allocation2 + $0x18] sm:$0xff] }
 0x178   :  { %1238 = vmatmul.mubr.f32.gmra.mrb[44].mxu0 %v2352_v47  ;;  %1773 = vmatprep.mubr.msk.f32.mxu1 %vm235_vm0, %v2441_v19  ;;  %v647_v47 = vld [vmem:[#allocation2 + $0x8] sm:$0xf0] }
 0x179   :  { %1779 = vmatprep.mubr.msk.f32.mxu0 %vm235_vm0, %v2426_v46  ;;  %2005 = vmatpush1.bf16.msra.mxu1 %v2004_v15  ;;  %v1405_v13 = vrot.slane %v647_v47, 4  ;;  %v843_v15 = vld [vmem:[#allocation3 + $0x370] sm:$0xff]  ;;  %v1415_v47 = vsel %vm1401_vm6, %v1410_v44, %v1414_v50  ;;  %v856_v50 = vld [vmem:[#allocation3 + $0x3d8] sm:$0xff] }
 0x17a   :  { %2032 = vmatpush1.bf16.msra.mxu0 %v2031_v59  ;;  %2006 = vmatprep.subr.bf16.mxu1 %v2118_v1  ;;  %v844_v59 = vld [vmem:[#allocation3 + $0x378] sm:$0xff] }
 0x17b   :  { %2033 = vmatprep.subr.bf16.mxu0 %v2118_v1  ;;  %1145 = vmatmul.mubr.f32.gmra.mrb[32].mxu1 %v2384_v28  ;;  %v1407_v20 = vsel %vm1401_vm6, %v1405_v13, %v1406_v9  ;;  %v2055_v9 = vpack.c.bf16 %v846_v43, %v845_v3  ;;  %v2085_v43 = vld [vmem:[#allocation2 + $0x28] sm:$0xff] }
 0x17c   :  { %1243 = vmatmul.mubr.f32.gmra.mrb[46].mxu0 %v2364_v7  ;;  %1774 = vmatprep.mubr.msk.f32.mxu1 %vm235_vm0, %v1027_v6  ;;  %v474_v7 = vld [vmem:[#allocation3 + $0x188] sm:$0xff]  ;;  %v1274_v6 = vrot.slane %v2426_v46, 2  ;;  %v848_v46 = vld [vmem:[#allocation3 + $0x398] sm:$0xff] }
 0x17d   :  { %1780 = vmatprep.mubr.msk.f32.mxu0 %vm235_vm0, %v2441_v19  ;;  %2008 = vmatpush1.bf16.msra.mxu1 %v2007_v27  ;;  %v2013_v21 = vpack.c.bf16 %v474_v7, %v473_v14  ;;  %v2052_v27 = vpack.c.bf16 %v844_v59, %v843_v15  ;;  %v847_v7 = vld [vmem:[#allocation3 + $0x390] sm:$0xff]  ;;  %v853_v15 = vld [vmem:[#allocation3 + $0x3c0] sm:$0xff]  ;;  %v854_v59 = vld [vmem:[#allocation3 + $0x3c8] sm:$0xff] }
 0x17e   :  { %2035 = vmatpush1.bf16.msra.mxu0 %v2034_v55  ;;  %2009 = vmatprep.subr.bf16.mxu1 %v2118_v1  ;;  %v1265_v55 = vsel %vm1257_vm5, %v1259_v48, %v1264_v58  ;;  %v1275_v16 = vsel %vm1257_vm5, %v1270_v63, %v1274_v6  ;;  %v855_v63 = vld [vmem:[#allocation3 + $0x3d0] sm:$0xff] }
 0x17f   :  { %2036 = vmatprep.subr.bf16.mxu0 %v2118_v1  ;;  %1150 = vmatmul.mubr.f32.gmra.mrb[34].mxu1 %v2408_v52  ;;  %v476_v52 = vld [vmem:[#allocation3 + $0x198] sm:$0xff] }
 0x180   :  { %1248 = vmatmul.mubr.f32.gmra.mrb[48].mxu0 %v2384_v28  ;;  %1781 = vmatprep.mubr.msk.f32.mxu1 %vm235_vm0, %v1263_v18  ;;  %v2016_v53 = vpack.c.bf16 %v476_v52, %v475_v22  ;;  %v1278_v18 = vrot.slane %v2441_v19, 2  ;;  %v2058_v22 = vpack.c.bf16 %v848_v46, %v847_v7  ;;  %v2087_v7 = vld [vmem:[#allocation2 + $0x48] sm:$0xff] }
 0x181   :  { %1787 = vmatprep.mubr.msk.f32.mxu0 %vm235_vm0, %v1407_v20  ;;  %2011 = vmatpush1.bf16.msra.mxu1 %v2010_v11  ;;  %v1269_v11 = vsel %vm1257_vm5, %v1264_v58, %v1268_v61  ;;  %v1422_v20 = vrot.slane %v2441_v19, 4  ;;  %v850_v19 = vld [vmem:[#allocation3 + $0x3a8] sm:$0xff]  ;;  %v1281_v58 = vsel %vm1257_vm5, %v1276_v25, %v1280_v38 }
 0x182   :  { %2038 = vmatpush1.bf16.msra.mxu0 %v2037_v12  ;;  %2012 = vmatprep.subr.bf16.mxu1 %v2118_v1  ;;  %v2652_v12 = vld [vmem:[#allocation2 + $0x40] sm:$0xff]  ;;  %v1279_v29 = vsel %vm1257_vm5, %v1274_v6, %v1278_v18 }
 0x183   :  { %2039 = vmatprep.subr.bf16.mxu0 %v2118_v1  ;;  %v1272_v13 = vrot.slane %v2652_v12, 2  ;;  %v1416_v14 = vrot.slane %v2652_v12, 4  ;;  %v1423_v32 = vsel %vm1401_vm6, %v1418_v8, %v1422_v20  ;;  %v1552_v8 = vrot.slane %v2622_v57, 6 }
 0x184   :  { %v1560_v46 = vrot.slane %v2652_v12, 6 }
 0x185   :  { %2014 = vmatpush1.bf16.msra.mxu1 %v2013_v21  ;;  %v459_v21 = vld [vmem:[#allocation2 + $0x68] sm:$0x3]  ;;  %v1273_v52 = vsel %vm1257_vm5, %v1268_v61, %v1272_v13  ;;  %v1417_v24 = vsel %vm1401_vm6, %v1412_v2, %v1416_v14  ;;  %v836_v61 = vld [vmem:[#allocation2] sm:$0xc0] }
 0x186   :  { %2041 = vmatpush1.bf16.msra.mxu0 %v2040_v0  ;;  %2015 = vmatprep.subr.bf16.mxu1 %v2118_v1  ;;  %v649_v0 = vld [vmem:[#allocation2 + $0x68] sm:$0xf]  ;;  %v1282_v33 = vrot.slane %v459_v21, 2  ;;  %v1546_v3 = vrot.slane %v836_v61, 6  ;;  %v2089_v21 = vld [vmem:[#allocation2 + $0x50] sm:$0xff] }
 0x187   :  { %2042 = vmatprep.subr.bf16.mxu0 %v2118_v1  ;;  %v1426_v34 = vrot.slane %v649_v0, 4  ;;  %v1564_v0 = vrot.slane %v2089_v21, 6 }
 0x188   :  { %v1283_v44 = vsel %vm1257_vm5, %v1278_v18, %v1282_v33 }
 0x189   :  { %2017 = vmatpush1.bf16.msra.mxu1 %v2016_v53  ;;  %v1420_v53 = vrot.slane %v2384_v28, 4  ;;  %v1277_v28 = vsel %vm1257_vm5, %v1272_v13, %v1276_v25  ;;  %v1427_v48 = vsel %vm1401_vm6, %v1422_v20, %v1426_v34  ;;  %v839_v20 = vld [vmem:[#allocation2 + $0x68] sm:$0x3f]  ;;  %v1565_v12 = vsel %vm1545_vm7, %v1560_v46, %v1564_v0 }
 0x18a   :  { %2044 = vmatpush1.bf16.msra.mxu0 %v2043_v26  ;;  %2018 = vmatprep.subr.bf16.mxu1 %v2118_v1  ;;  %v849_v26 = vld [vmem:[#allocation3 + $0x3a0] sm:$0xff] }
 0x18b   :  { %2045 = vmatprep.subr.bf16.mxu0 %v2118_v1  ;;  %v1425_v23 = vsel %vm1401_vm6, %v1420_v53, %v1424_v39 }
 0x18d   :  { %2020 = vmatpush1.bf16.msra.mxu1 %v2019_v54  ;;  %v2061_v54 = vpack.c.bf16 %v850_v19, %v849_v26 }
 0x18e   :  { %2047 = vmatpush1.bf16.msra.mxu0 %v2046_v37  ;;  %2048 = vmatprep.subr.bf16.mxu1 %v2118_v1  ;;  %v1421_v37 = vsel %vm1401_vm6, %v1416_v14, %v1420_v53 }
 0x190   :  { %1367 = vmatmul.mubr.f32.vlgmr.msra.gmra.mrb[36].mxu1 %v1260_v51  ;;  %v2064_v51 = vpack.c.bf16 %v852_v41, %v851_v40 }
 0x191   :  { %1511 = vmatmul.mubr.f32.vlgmr.msra.gmra.mrb[50].mxu0 %v1404_v56  ;;  %1782 = vmatprep.mubr.msk.f32.mxu1 %vm235_vm0, %v1267_v60  ;;  %v1549_v56 = vrot.slane %v837_v42, 6 }
 0x192   :  { %1788 = vmatprep.mubr.msk.f32.mxu0 %vm235_vm0, %v1411_v62  ;;  %2050 = vmatpush1.bf16.msra.mxu1 %v2049_v49  ;;  %v1550_v49 = vrot.slane %v2084_v5, 6  ;;  %v2067_v62 = vpack.c.bf16 %v854_v59, %v853_v15 }
 0x193   :  { %2051 = vmatprep.subr.bf16.mxu1 %v2118_v1 }
 0x194   :  { %1372 = vmatmul.mubr.f32.gmra.mrb[38].mxu1 %v1265_v55  ;;  %v1551_v60 = vsel %vm1545_vm7, %v1549_v56, %v1550_v49  ;;  %v857_v55 = vld [vmem:[#allocation3 + $0x3e0] sm:$0xff] }
 0x195   :  { %1516 = vmatmul.mubr.f32.gmra.mrb[52].mxu0 %v1409_v30  ;;  %1783 = vmatprep.mubr.msk.f32.mxu1 %vm235_vm0, %v1271_v4  ;;  %v858_v30 = vld [vmem:[#allocation3 + $0x3e8] sm:$0xff]  ;;  %v1554_v4 = vrot.slane %v2085_v43, 6 }
 0x196   :  { %1789 = vmatprep.mubr.msk.f32.mxu0 %vm235_vm0, %v1415_v47  ;;  %2053 = vmatpush1.bf16.msra.mxu1 %v2052_v27  ;;  %v2070_v27 = vpack.c.bf16 %v856_v50, %v855_v63  ;;  %v2073_v2 = vpack.c.bf16 %v858_v30, %v857_v55  ;;  %v1547_v47 = vrot.slane %v2615_v45, 6  ;;  %v1562_v45 = vrot.slane %v2087_v7, 6 }
 0x197   :  { %2054 = vmatprep.subr.bf16.mxu1 %v2118_v1 }
 0x198   :  { %1377 = vmatmul.mubr.f32.gmra.mrb[40].mxu1 %v1269_v11  ;;  %v1548_v6 = vsel %vm1545_vm7, %v1546_v3, %v1547_v47  ;;  %v2086_v11 = vld [vmem:[#allocation2 + $0x38] sm:$0xff]  ;;  %v1553_v13 = vsel %vm1545_vm7, %v1547_v47, %v1552_v8 }
 0x199   :  { %1521 = vmatmul.mubr.f32.gmra.mrb[54].mxu0 %v1413_v10  ;;  %1784 = vmatprep.mubr.msk.f32.mxu1 %vm235_vm0, %v1275_v16  ;;  %v1558_v10 = vrot.slane %v2086_v11, 6 }
 0x19a   :  { %1790 = vmatprep.mubr.msk.f32.mxu0 %vm235_vm0, %v1419_v17  ;;  %2056 = vmatpush1.bf16.msra.mxu1 %v2055_v9  ;;  %v1555_v9 = vsel %vm1545_vm7, %v1550_v49, %v1554_v4  ;;  %v2088_v17 = vld [vmem:[#allocation2 + $0x58] sm:$0xff] }
 0x19b   :  { %2057 = vmatprep.subr.bf16.mxu1 %v2118_v1  ;;  %v1559_v14 = vsel %vm1545_vm7, %v1554_v4, %v1558_v10  ;;  %v1563_v16 = vsel %vm1545_vm7, %v1558_v10, %v1562_v45  ;;  %v1566_v18 = vrot.slane %v2088_v17, 6 }
 0x19c   :  { %1382 = vmatmul.mubr.f32.gmra.mrb[42].mxu1 %v1273_v52  ;;  %v1570_v52 = vrot.slane %v839_v20, 6 }
 0x19d   :  { %1526 = vmatmul.mubr.f32.gmra.mrb[56].mxu0 %v1417_v24  ;;  %1785 = vmatprep.mubr.msk.f32.mxu1 %vm235_vm0, %v1279_v29  ;;  %v838_v24 = vld [vmem:[#allocation2 + $0x60] sm:$0x3f] }
 0x19e   :  { %1791 = vmatprep.mubr.msk.f32.mxu0 %vm235_vm0, %v1423_v32  ;;  %2059 = vmatpush1.bf16.msra.mxu1 %v2058_v22  ;;  %v1567_v22 = vsel %vm1545_vm7, %v1562_v45, %v1566_v18  ;;  %v1568_v25 = vrot.slane %v838_v24, 6  ;;  %v1571_v53 = vsel %vm1545_vm7, %v1566_v18, %v1570_v52 }
 0x19f   :  { %2060 = vmatprep.subr.bf16.mxu1 %v2118_v1 }
 0x1a0   :  { %1387 = vmatmul.mubr.f32.gmra.mrb[44].mxu1 %v1277_v28  ;;  %v1569_v26 = vsel %vm1545_vm7, %v1564_v0, %v1568_v25 }
 0x1a1   :  { %1531 = vmatmul.mubr.f32.gmra.mrb[58].mxu0 %v1421_v37  ;;  %1786 = vmatprep.mubr.msk.f32.mxu1 %vm235_vm0, %v1283_v44 }
 0x1a2   :  { %1792 = vmatprep.mubr.msk.f32.mxu0 %vm235_vm0, %v1427_v48  ;;  %2062 = vmatpush1.bf16.msra.mxu1 %v2061_v54 }
 0x1a3   :  { %2063 = vmatprep.subr.bf16.mxu1 %v2118_v1 }
 0x1a4   :  { %1392 = vmatmul.mubr.f32.gmra.mrb[46].mxu1 %v1281_v58 }
 0x1a5   :  { %1536 = vmatmul.mubr.f32.gmra.mrb[60].mxu0 %v1425_v23  ;;  %1793 = vmatprep.mubr.msk.f32.mxu1 %vm235_vm0, %v1551_v60 }
 0x1a6   :  { %2065 = vmatpush1.bf16.msra.mxu1 %v2064_v51 }
 0x1a7   :  { %2066 = vmatprep.subr.bf16.mxu1 %v2118_v1 }
 0x1aa   :  { %2068 = vmatpush1.bf16.msra.mxu1 %v2067_v62 }
 0x1ab   :  { %2069 = vmatprep.subr.bf16.mxu1 %v2118_v1 }
 0x1ae   :  { %2071 = vmatpush1.bf16.msra.mxu1 %v2070_v27 }
 0x1af   :  { %2072 = vmatprep.subr.bf16.mxu1 %v2118_v1  ;;  %v1556_v1 = vrot.slane %v2639_v31, 6 }
 0x1b1   :  { %v1557_v57 = vsel %vm1545_vm7, %v1552_v8, %v1556_v1  ;;  %v1561_v31 = vsel %vm1545_vm7, %v1556_v1, %v1560_v46 }
 0x1b2   :  { %2074 = vmatpush1.bf16.msra.mxu1 %v2073_v2 }
 0x1b5   :  { %1655 = vmatmul.mubr.f32.vlgmr.msra.gmra.mrb[48].mxu1 %v1548_v6 }
 0x1b6   :  { %1794 = vmatprep.mubr.msk.f32.mxu1 %vm235_vm0, %v1555_v9 }
 0x1b9   :  { %1660 = vmatmul.mubr.f32.gmra.mrb[50].mxu1 %v1553_v13 }
 0x1ba   :  { %1795 = vmatprep.mubr.msk.f32.mxu1 %vm235_vm0, %v1559_v14 }
 0x1bd   :  { %1665 = vmatmul.mubr.f32.gmra.mrb[52].mxu1 %v1557_v57 }
 0x1be   :  { %1796 = vmatprep.mubr.msk.f32.mxu1 %vm235_vm0, %v1563_v16 }
 0x1c1   :  { %1670 = vmatmul.mubr.f32.gmra.mrb[54].mxu1 %v1561_v31 }
 0x1c2   :  { %1797 = vmatprep.mubr.msk.f32.mxu1 %vm235_vm0, %v1567_v22 }
 0x1c5   :  { %1675 = vmatmul.mubr.f32.gmra.mrb[56].mxu1 %v1565_v12 }
 0x1c6   :  { %1798 = vmatprep.mubr.msk.f32.mxu1 %vm235_vm0, %v1571_v53 }
 0x1c9   :  { %1680 = vmatmul.mubr.f32.gmra.mrb[58].mxu1 %v1569_v26 }
 0x1f5   :  { %v427_v19 = vpop.f32.mrb[0].mxu1  ;;  %v2706_v29 = vpop.f32.mrb[14].mxu0 }
 0x1f6   :  { %v429_v32 = vpop.f32.mrb[1].mxu1  ;;  %v619_v33 = vpop.f32.mrb[15].mxu0 }
 0x1f9   :  { %v432_v34 = vpop.f32.mrb[2].mxu1  ;;  %v2708_v35 = vpop.f32.mrb[16].mxu0 }
 0x1fa   :  { %v434_v36 = vpop.f32.mrb[3].mxu1  ;;  %v624_v54 = vpop.f32.mrb[17].mxu0 }
 0x1fd   :  { %v437_v28 = vpop.f32.mrb[4].mxu1  ;;  %v2710_v37 = vpop.f32.mrb[18].mxu0 }
 0x1fe   :  { %v439_v38 = vpop.f32.mrb[5].mxu1  ;;  %v629_v39 = vpop.f32.mrb[19].mxu0 }
 0x201   :  { %v442_v40 = vpop.f32.mrb[6].mxu1  ;;  %v2712_v41 = vpop.f32.mrb[20].mxu0 }
 0x202   :  { %v444_v42 = vpop.f32.mrb[7].mxu1  ;;  %v634_v44 = vpop.f32.mrb[21].mxu0 }
 0x205   :  { %v447_v48 = vpop.f32.mrb[8].mxu1  ;;  %v2714_v5 = vpop.f32.mrb[22].mxu0 }
 0x206   :  { %v449_v49 = vpop.f32.mrb[9].mxu1  ;;  %v639_v51 = vpop.f32.mrb[23].mxu0 }
 0x209   :  { %v452_v56 = vpop.f32.mrb[10].mxu1 }
 0x20a   :  { %v2716_v58 = vpop.f32.mrb[24].mxu0  ;;  %v454_v23 = vpop.f32.mrb[11].mxu1 }
 0x20b   :  { %v644_v15 = vpop.f32.mrb[25].mxu0 }
 0x219   :  { %v807_v59 = vpop.f32.mrb[12].mxu1 }
 0x21a   :  { %v2718_v60 = vpop.f32.mrb[26].mxu0  ;;  %v809_v62 = vpop.f32.mrb[13].mxu1 }
 0x21b   :  { %v999_v63 = vpop.f32.mrb[27].mxu0 }
 0x21d   :  { %v812_v50 = vpop.f32.mrb[14].mxu1 }
 0x21e   :  { %v2720_v27 = vpop.f32.mrb[28].mxu0  ;;  %v814_v55 = vpop.f32.mrb[15].mxu1 }
 0x21f   :  { %v1004_v30 = vpop.f32.mrb[29].mxu0 }
 0x221   :  { %v2722_v61 = vpop.f32.mrb[16].mxu1 }
 0x222   :  { %v2724_v2 = vpop.f32.mrb[30].mxu0  ;;  %v819_v3 = vpop.f32.mrb[17].mxu1 }
 0x223   :  { %v1009_v43 = vpop.f32.mrb[31].mxu0 }
 0x225   :  { %v2726_v4 = vpop.f32.mrb[18].mxu1 }
 0x226   :  { %v2728_v47 = vpop.f32.mrb[32].mxu0  ;;  %v824_v6 = vpop.f32.mrb[19].mxu1 }
 0x227   :  { %v1014_v8 = vpop.f32.mrb[33].mxu0 }
 0x229   :  { %v2730_v9 = vpop.f32.mrb[20].mxu1 }
 0x22a   :  { %v2732_v11 = vpop.f32.mrb[34].mxu0  ;;  %v829_v10 = vpop.f32.mrb[21].mxu1 }
 0x22b   :  { %v1019_v13 = vpop.f32.mrb[35].mxu0 }
 0x22d   :  { %v2734_v1 = vpop.f32.mrb[22].mxu1 }
 0x22e   :  { %v2736_v14 = vpop.f32.mrb[36].mxu0  ;;  %v834_v7 = vpop.f32.mrb[23].mxu1 }
 0x22f   :  { %v1024_v45 = vpop.f32.mrb[37].mxu0 }
 0x23e   :  { %v2738_v57 = vpop.f32.mrb[24].mxu1 }
 0x23f   :  { %v1224_v46 = vpop.f32.mrb[38].mxu0  ;;  %v1128_v17 = vpop.f32.mrb[25].mxu1 }
 0x240   :  { %v1225_v16 = vadd.f32 %v1224_v46, %v427_v19  ;;  %v1226_v18 = vpop.f32.mrb[39].mxu0 }
 0x242   :  { %v2740_v20 = vpop.f32.mrb[26].mxu1 }
 0x243   :  { %v1229_v31 = vpop.f32.mrb[40].mxu0  ;;  %v1133_v0 = vpop.f32.mrb[27].mxu1 }
 0x244   :  { %v1230_v21 = vadd.f32 %v1229_v31, %v432_v34  ;;  %v1231_v22 = vpop.f32.mrb[41].mxu0 }
 0x246   :  { %v2742_v52 = vpop.f32.mrb[28].mxu1 }
 0x247   :  { %v1234_v24 = vpop.f32.mrb[42].mxu0  ;;  %v1138_v25 = vpop.f32.mrb[29].mxu1 }
 0x248   :  { %v1235_v12 = vadd.f32 %v1234_v24, %v437_v28  ;;  %v1236_v53 = vpop.f32.mrb[43].mxu0 }
 0x24a   :  { %v2744_v26 = vpop.f32.mrb[30].mxu1 }
 0x24b   :  { %v1239_v32 = vpop.f32.mrb[44].mxu0  ;;  %v1143_v36 = vpop.f32.mrb[31].mxu1 }
 0x24c   :  { %v1240_v33 = vadd.f32 %v1239_v32, %v442_v40  ;;  %v1241_v19 = vpop.f32.mrb[45].mxu0 }
 0x24e   :  { %v2746_v54 = vpop.f32.mrb[32].mxu1 }
 0x24f   :  { %v1244_v38 = vpop.f32.mrb[46].mxu0  ;;  %v1148_v42 = vpop.f32.mrb[33].mxu1 }
 0x250   :  { %v1245_v39 = vadd.f32 %v1244_v38, %v447_v48  ;;  %v1246_v34 = vpop.f32.mrb[47].mxu0 }
 0x252   :  { %v2748_v44 = vpop.f32.mrb[34].mxu1 }
 0x253   :  { %v1249_v49 = vpop.f32.mrb[48].mxu0  ;;  %v1153_v23 = vpop.f32.mrb[35].mxu1 }
 0x254   :  { %v1250_v51 = vadd.f32 %v1249_v49, %v452_v56  ;;  %v1251_v28 = vpop.f32.mrb[49].mxu0 }
 0x263   :  { %v1368_v15 = vpop.f32.mrb[36].mxu1 }
 0x264   :  { %v1512_v62 = vpop.f32.mrb[50].mxu0  ;;  %v1369_v63 = vadd.f32 %v1368_v15, %v2706_v29  ;;  %v1370_v40 = vpop.f32.mrb[37].mxu1 }
 0x265   :  { %v1513_v55 = vadd.f32 %v1512_v62, %v807_v59  ;;  %v1514_v30 = vpop.f32.mrb[51].mxu0 }
 0x266   :  { %v1685_v3 = vadd.f32 %v1369_v63, %v1225_v16 }
 0x267   :  { %v1373_v43 = vpop.f32.mrb[38].mxu1 }
 0x268   :  { %v1517_v6 = vpop.f32.mrb[52].mxu0  ;;  %v1374_v48 = vadd.f32 %v1373_v43, %v2708_v35  ;;  %v1375_v10 = vpop.f32.mrb[39].mxu1 }
 0x269   :  { %v1518_v8 = vadd.f32 %v1517_v6, %v812_v50  ;;  %v1519_v13 = vpop.f32.mrb[53].mxu0 }
 0x26a   :  { %v1686_v7 = vadd.f32 %v1374_v48, %v1230_v21 }
 0x26b   :  { %v1378_v45 = vpop.f32.mrb[40].mxu1 }
 0x26c   :  { %v1522_v56 = vpop.f32.mrb[54].mxu0  ;;  %v1379_v46 = vadd.f32 %v1378_v45, %v2710_v37  ;;  %v1380_v18 = vpop.f32.mrb[41].mxu1 }
 0x26d   :  { %v1523_v17 = vadd.f32 %v1522_v56, %v2722_v61  ;;  %v1524_v29 = vpop.f32.mrb[55].mxu0 }
 0x26e   :  { %v1687_v59 = vadd.f32 %v1379_v46, %v1235_v12 }
 0x26f   :  { %v1383_v31 = vpop.f32.mrb[42].mxu1 }
 0x270   :  { %v1527_v0 = vpop.f32.mrb[56].mxu0  ;;  %v1384_v16 = vadd.f32 %v1383_v31, %v2712_v41  ;;  %v1385_v35 = vpop.f32.mrb[43].mxu1 }
 0x271   :  { %v1528_v22 = vadd.f32 %v1527_v0, %v2726_v4  ;;  %v1529_v50 = vpop.f32.mrb[57].mxu0 }
 0x272   :  { %v1688_v24 = vadd.f32 %v1384_v16, %v1240_v33 }
 0x273   :  { %v1388_v25 = vpop.f32.mrb[44].mxu1 }
 0x274   :  { %v1532_v21 = vpop.f32.mrb[58].mxu0  ;;  %v1389_v53 = vadd.f32 %v1388_v25, %v2714_v5  ;;  %v1390_v32 = vpop.f32.mrb[45].mxu1 }
 0x275   :  { %v1533_v37 = vadd.f32 %v1532_v21, %v2730_v9  ;;  %v1534_v61 = vpop.f32.mrb[59].mxu0 }
 0x276   :  { %v1689_v36 = vadd.f32 %v1389_v53, %v1245_v39  ;;  %v1799_v39 = vld [vmem:[%s2797_s4] ss:$0 sm:$0xff] }
 0x277   :  { %v1393_v19 = vpop.f32.mrb[46].mxu1 }
 0x278   :  { %v1537_v12 = vpop.f32.mrb[60].mxu0  ;;  %v1394_v38 = vadd.f32 %v1393_v19, %v2716_v58  ;;  %v1395_v42 = vpop.f32.mrb[47].mxu1 }
 0x279   :  { %v1538_v41 = vadd.f32 %v1537_v12, %v2734_v1  ;;  %v1539_v4 = vpop.f32.mrb[61].mxu0 }
 0x27a   :  { %v1690_v34 = vadd.f32 %v1394_v38, %v1250_v51 }
 0x288   :  { %v1656_v49 = vpop.f32.mrb[48].mxu1 }
 0x289   :  { %v1657_v33 = vadd.f32 %v1656_v49, %v2718_v60  ;;  %v1658_v23 = vpop.f32.mrb[49].mxu1 }
 0x28b   :  { %v1691_v28 = vadd.f32 %v1657_v33, %v1513_v55 }
 0x28c   :  { %v1661_v5 = vpop.f32.mrb[50].mxu1 }
 0x28d   :  { %v1697_v15 = vadd.f32 %v1691_v28, %v1685_v3  ;;  %v1662_v9 = vadd.f32 %v1661_v5, %v2720_v27  ;;  %v1663_v62 = vpop.f32.mrb[51].mxu1 }
 0x28f   :  { %v1703_v58 = vadd.f32 %v1697_v15, %v2738_v57  ;;  %v1692_v1 = vadd.f32 %v1662_v9, %v1518_v8 }
 0x290   :  { %v1666_v63 = vpop.f32.mrb[52].mxu1 }
 0x291   :  { %v1716_v40 = vadd.f32 %v1799_v39, %v1703_v58  ;;  %v1698_v51 = vadd.f32 %v1692_v1, %v1686_v7  ;;  %v1667_v30 = vadd.f32 %v1666_v63, %v2724_v2  ;;  %v1668_v60 = vpop.f32.mrb[53].mxu1 }
 0x293   :  { %v1722_v43 = vmin.f32 %v1716_v40, 6.0  ;;  %v1704_v55 = vadd.f32 %v1698_v51, %v2740_v20  ;;  %v1693_v3 = vadd.f32 %v1667_v30, %v1523_v17 }
 0x294   :  { %v1671_v6 = vpop.f32.mrb[54].mxu1 }
 0x295   :  { %v1728_v27 = vmul.f32 0.027777778, %v1722_v43  ;;  %v1717_v48 = vadd.f32 %v1799_v39, %v1704_v55  ;;  %v1699_v10 = vadd.f32 %v1693_v3, %v1687_v59  ;;  %v1672_v13 = vadd.f32 %v1671_v6, %v2728_v47  ;;  %v1673_v45 = vpop.f32.mrb[55].mxu1 }
 0x297   :  { %1734 = vst [vmem:[%s2798_s5] sm:$0xff] %v1728_v27  ;;  %v1723_v57 = vmin.f32 %v1717_v48, 6.0  ;;  %v1705_v8 = vadd.f32 %v1699_v10, %v2742_v52  ;;  %v1694_v2 = vadd.f32 %v1672_v13, %v1528_v22 }
 0x298   :  { %v1676_v7 = vpop.f32.mrb[56].mxu1 }
 0x299   :  { %v1729_v56 = vmul.f32 0.027777778, %v1723_v57  ;;  %v1718_v46 = vadd.f32 %v1799_v39, %v1705_v8  ;;  %v1700_v20 = vadd.f32 %v1694_v2, %v1688_v24  ;;  %v1677_v17 = vadd.f32 %v1676_v7, %v2732_v11  ;;  %v1678_v18 = vpop.f32.mrb[57].mxu1 }
 0x29b   :  { %1735 = vst [vmem:[%s2798_s5 + $0x8] sm:$0xff] %v1729_v56  ;;  %v1724_v47 = vmin.f32 %v1718_v46, 6.0  ;;  %v1706_v29 = vadd.f32 %v1700_v20, %v2744_v26  ;;  %v1695_v59 = vadd.f32 %v1677_v17, %v1533_v37 }
 0x29c   :  { %v1681_v31 = vpop.f32.mrb[58].mxu1 }
 0x29d   :  { %v1730_v0 = vmul.f32 0.027777778, %v1724_v47  ;;  %v1719_v16 = vadd.f32 %v1799_v39, %v1706_v29  ;;  %v1701_v52 = vadd.f32 %v1695_v59, %v1689_v36  ;;  %v1682_v22 = vadd.f32 %v1681_v31, %v2736_v14  ;;  %v1683_v35 = vpop.f32.mrb[59].mxu1 }
 0x29f   :  { %1736 = vst [vmem:[%s2798_s5 + $0x10] sm:$0xff] %v1730_v0  ;;  %v1725_v11 = vmin.f32 %v1719_v16, 6.0  ;;  %v1707_v50 = vadd.f32 %v1701_v52, %v2746_v54  ;;  %v1696_v24 = vadd.f32 %v1682_v22, %v1538_v41 }
 0x2a1   :  { %v1731_v25 = vmul.f32 0.027777778, %v1725_v11  ;;  %v1720_v21 = vadd.f32 %v1799_v39, %v1707_v50  ;;  %v1702_v53 = vadd.f32 %v1696_v24, %v1690_v34 }
 0x2a3   :  { %1737 = vst [vmem:[%s2798_s5 + $0x18] sm:$0xff] %v1731_v25  ;;  %v1726_v26 = vmin.f32 %v1720_v21, 6.0  ;;  %v1708_v37 = vadd.f32 %v1702_v53, %v2748_v44 }
 0x2a5   :  { %v1732_v14 = vmul.f32 0.027777778, %v1726_v26  ;;  %v1721_v32 = vadd.f32 %v1799_v39, %v1708_v37 }
 0x2a7   :  { %1738 = vst [vmem:[%s2798_s5 + $0x20] sm:$0xff] %v1732_v14  ;;  %v1727_v61 = vmin.f32 %v1721_v32, 6.0 }
 0x2a9   :  { %v1733_v36 = vmul.f32 0.027777778, %v1727_v61 }
 0x2ab   :  { %1739 = vst [vmem:[%s2798_s5 + $0x28] sm:$0xff] %v1733_v36 }
 0x2ac   :  { %1744 = vsyncpa [#allocation4], 1 }

</bundles_post_ra>
